<compile_context>
chip_gen: v7x
topology: tpu7x:2x2x1
jax: 0.10.0
libtpu: 0.0.40
codegen_flags: <defaults>
</compile_context>

<pallas_src>
import math
from functools import partial

import jax
import jax.numpy as jnp
from jax import lax
from jax.experimental import pallas as pl
from jax.experimental.pallas import tpu as pltpu


# ----------------------------- Pallas kernel ------------------------------- #

def _fused_encoder_kernel(x_ref, pe_ref, bias_ref, hm_ref,
                          wq_ref, bq_ref, wk_ref, bk_ref, wv_ref, bv_ref,
                          wo_ref, bo_ref, g1_ref, be1_ref,
                          w1_ref, b1_ref, w2_ref, b2_ref, g2_ref, be2_ref,
                          o_ref, xs_ref, *, nhead, eps):
    layer = pl.program_id(1)
    bblk, T, D = x_ref.shape
    rows = bblk * T
    f32, bf16 = jnp.float32, jnp.bfloat16

    # First layer of each batch block: load x, add positional encoding, park the
    # residual stream in VMEM scratch (it stays VMEM-resident across all layers).
    @pl.when(layer == 0)
    def _():
        xs_ref[...] = (x_ref[...] + pe_ref[...]).reshape(rows, D)

    x = xs_ref[...]                                   # (rows, D) f32 residual stream
    x16 = x.astype(bf16)

    # ---- QKV projections: bf16 operands, f32 accumulate (1/sqrt(hd) folded into wq/bq).
    q = jnp.dot(x16, wq_ref[...], preferred_element_type=f32) + bq_ref[...]
    k = jnp.dot(x16, wk_ref[...], preferred_element_type=f32) + bk_ref[...]
    v = jnp.dot(x16, wv_ref[...], preferred_element_type=f32) + bv_ref[...]

    q3 = q.reshape(bblk, T, D)                        # leading-dim split: layout-free
    k3 = k.reshape(bblk, T, D).astype(bf16)
    v3 = v.reshape(bblk, T, D).astype(bf16)

    # ---- stacked-heads attention: row h*T+t of qh is query t of head h, with only that
    #      head's lanes non-zero (hm precomputed on the host).  One batched MXU matmul
    #      then gives scores for every head of every sequence in the block.
    qh = jnp.concatenate([q3] * nhead, axis=1)        # (bblk, nhead*T, D) f32
    qh = (qh * hm_ref[...]).astype(bf16)

    s = jnp.einsum("bqd,bkd->bqk", qh, k3,
                   preferred_element_type=f32)        # (bblk, nhead*T, T)
    s = s + bias_ref[...]                             # key-padding additive bias
    s = s - jnp.max(s, axis=-1, keepdims=True)
    p = jnp.exp(s)
    p = p * pl.reciprocal(jnp.sum(p, axis=-1, keepdims=True), approx=True)

    o = jnp.einsum("bqk,bkd->bqd", p.astype(bf16), v3,
                   preferred_element_type=f32)        # (bblk, nhead*T, D)
    o = o * hm_ref[...]                               # keep each row's own-head lanes
    ctx = o[:, 0:T, :]
    for h in range(1, nhead):                         # merge heads with adds (no concat)
        ctx = ctx + o[:, h * T:(h + 1) * T, :]
    ctx = ctx.reshape(rows, D)

    attn = jnp.dot(ctx.astype(bf16), wo_ref[...],
                   preferred_element_type=f32) + bo_ref[...]

    # ---- residual + LayerNorm 1 (post-norm), f32
    h1 = x + attn
    mu = jnp.mean(h1, axis=-1, keepdims=True)
    var = jnp.mean((h1 - mu) ** 2, axis=-1, keepdims=True)
    h1 = (h1 - mu) * lax.rsqrt(var + eps) * g1_ref[...] + be1_ref[...]

    # ---- feed-forward (relu): bf16 matmuls, f32 accumulate
    ff = jnp.dot(h1.astype(bf16), w1_ref[...], preferred_element_type=f32) + b1_ref[...]
    ff = jnp.maximum(ff, 0.0)
    ff = jnp.dot(ff.astype(bf16), w2_ref[...], preferred_element_type=f32) + b2_ref[...]

    # ---- residual + LayerNorm 2
    h2 = h1 + ff
    mu2 = jnp.mean(h2, axis=-1, keepdims=True)
    var2 = jnp.mean((h2 - mu2) ** 2, axis=-1, keepdims=True)
    out = (h2 - mu2) * lax.rsqrt(var2 + eps) * g2_ref[...] + be2_ref[...]

    xs_ref[...] = out                                 # residual stream for next layer

    @pl.when(layer == pl.num_programs(1) - 1)
    def _():
        o_ref[...] = out.reshape(bblk, T, D)          # single HBM writeback at the end


# ------------------------------ host wrapper -------------------------------- #

def _pick_bblk(B, T):
    """Batch-block size: fill the MXU M dim (~256 rows) per step, but keep >=2 batch
    blocks when B >= 2 so a v7x megacore can shard the parallel grid axis."""
    target = max(1, 256 // max(T, 1))
    best = 1
    for c in range(1, B + 1):
        if B % c == 0 and c <= target and (B < 2 or B // c >= 2):
            best = c
    return best


def prepare_fused_params(layers, nhead):
    """One-time host-side prep: stack per-layer weights on a leading layer axis, fold
    1/sqrt(head_dim) into the Q projection, and cast matmul weights to bf16."""
    D = layers[0]["wq"].shape[0]
    hd = D // nhead
    scale = 1.0 / math.sqrt(hd)
    bf16, f32 = jnp.bfloat16, jnp.float32

    def stack(name, dtype, scl=1.0):
        return jnp.stack([(l[name] * scl).astype(dtype) for l in layers], axis=0)

    return dict(
        wq=stack("wq", bf16, scale), bq=stack("bq", f32, scale),
        wk=stack("wk", bf16), bk=stack("bk", f32),
        wv=stack("wv", bf16), bv=stack("bv", f32),
        wo=stack("wo", bf16), bo=stack("bo", f32),
        g1=stack("g1", f32), be1=stack("be1", f32),
        w1=stack("w1", bf16), b1=stack("b1", f32),
        w2=stack("w2", bf16), b2=stack("b2", f32),
        g2=stack("g2", f32), be2=stack("be2", f32),
    )


def temporal_transformer_encoder(x, temporal_mask, fused, nhead):
    """x: (B, T, D); temporal_mask: (B, T) with 1=valid, 0=padded (or None).
    `fused` is the stacked/bf16 parameter dict from prepare_fused_params."""
    B, T, D = x.shape
    L = fused["wq"].shape[0]
    F = fused["w1"].shape[2]
    hd = D // nhead
    bblk = _pick_bblk(B, T)
    n_bb = B // bblk

    pe = sinusoidal_pe(T, D)[None]                    # (1, T, D)

    if temporal_mask is None:
        kp_bias = jnp.zeros((B, 1, T), jnp.float32)
    else:
        m = temporal_mask.astype(jnp.float32).reshape(B, 1, T)
        kp_bias = jnp.where(m > 0.5, 0.0, -1e30).astype(jnp.float32)

    # Per-lane head-selection mask for the stacked-heads layout (hoisted out of kernel).
    row_head = jnp.arange(nhead * T, dtype=jnp.int32)[:, None] // T
    lane_head = jnp.arange(D, dtype=jnp.int32)[None, :] // hd
    hm = (row_head == lane_head).astype(jnp.float32)  # (nhead*T, D)

    kernel = partial(_fused_encoder_kernel, nhead=nhead, eps=1e-5)

    def wspec(shape):     # stacked per-layer parameter; prefetched one layer ahead
        n = len(shape)
        return pl.BlockSpec((None,) + shape, lambda b, l, _n=n: (l,) + (0,) * _n)

    def cspec(shape):     # constant across the whole grid
        n = len(shape)
        return pl.BlockSpec(shape, lambda b, l, _n=n: (0,) * _n)

    return pl.pallas_call(
        kernel,
        out_shape=jax.ShapeDtypeStruct((B, T, D), jnp.float32),
        grid=(n_bb, L),
        in_specs=[
            pl.BlockSpec((bblk, T, D), lambda b, l: (b, 0, 0)),    # x
            cspec((1, T, D)),                                      # positional encoding
            pl.BlockSpec((bblk, 1, T), lambda b, l: (b, 0, 0)),    # key-padding bias
            cspec((nhead * T, D)),                                 # head lane mask
            wspec((D, D)), wspec((1, D)),                          # wq bq
            wspec((D, D)), wspec((1, D)),                          # wk bk
            wspec((D, D)), wspec((1, D)),                          # wv bv
            wspec((D, D)), wspec((1, D)),                          # wo bo
            wspec((1, D)), wspec((1, D)),                          # LN1 gamma/beta
            wspec((D, F)), wspec((1, F)),                          # w1 b1
            wspec((F, D)), wspec((1, D)),                          # w2 b2
            wspec((1, D)), wspec((1, D)),                          # LN2 gamma/beta
        ],
        out_specs=pl.BlockSpec((bblk, T, D), lambda b, l: (b, 0, 0)),
        scratch_shapes=[pltpu.VMEM((bblk * T, D), jnp.float32)],   # residual stream
        compiler_params=pltpu.CompilerParams(
            dimension_semantics=("parallel", "arbitrary"),
            vmem_limit_bytes=32 * 1024 * 1024),
    )(x, pe, kp_bias, hm,
      fused["wq"], fused["bq"], fused["wk"], fused["bk"],
      fused["wv"], fused["bv"], fused["wo"], fused["bo"],
      fused["g1"], fused["be1"],
      fused["w1"], fused["b1"], fused["w2"], fused["b2"],
      fused["g2"], fused["be2"])


# ------------------------------ glue (JAX) --------------------------------- #

def sinusoidal_pe(seq_len, d_model):
    position = jnp.arange(seq_len, dtype=jnp.float32)[:, None]
    div_term = jnp.exp(jnp.arange(0, d_model, 2, dtype=jnp.float32)
                       * (-math.log(10000.0) / d_model))
    pe = jnp.zeros((seq_len, d_model), jnp.float32)
    pe = pe.at[:, 0::2].set(jnp.sin(position * div_term))
    pe = pe.at[:, 1::2].set(jnp.cos(position * div_term))
    return pe


def init_params(key, d_model, nhead, dim_ff, num_layers):
    def rn(k, shape, scale=0.05):
        return (scale * jax.random.normal(k, shape)).astype(jnp.float32)

    layers = []
    for l in range(num_layers):
        ks = jax.random.split(jax.random.fold_in(key, l), 12)
        layers.append(dict(
            wq=rn(ks[0], (d_model, d_model)), bq=rn(ks[1], (1, d_model)),
            wk=rn(ks[2], (d_model, d_model)), bk=rn(ks[3], (1, d_model)),
            wv=rn(ks[4], (d_model, d_model)), bv=rn(ks[5], (1, d_model)),
            wo=rn(ks[6], (d_model, d_model)), bo=rn(ks[7], (1, d_model)),
            g1=jnp.ones((1, d_model), jnp.float32),
            be1=jnp.zeros((1, d_model), jnp.float32),
            w1=rn(ks[8], (d_model, dim_ff)), b1=rn(ks[9], (1, dim_ff)),
            w2=rn(ks[10], (dim_ff, d_model)), b2=rn(ks[11], (1, d_model)),
            g2=jnp.ones((1, d_model), jnp.float32),
            be2=jnp.zeros((1, d_model), jnp.float32),
        ))
    return layers


# ------------------------- pure-JAX reference ------------------------------ #

def _ln(x, g, b, eps=1e-5):
    mu = jnp.mean(x, axis=-1, keepdims=True)
    var = jnp.mean((x - mu) ** 2, axis=-1, keepdims=True)
    return (x - mu) * lax.rsqrt(var + eps) * g + b


def _layer_ref(x, mask, p, nhead):
    B, T, D = x.shape
    hd = D // nhead
    scale = 1.0 / math.sqrt(hd)
    q = (x @ p["wq"] + p["bq"][0]).reshape(B, T, nhead, hd)
    k = (x @ p["wk"] + p["bk"][0]).reshape(B, T, nhead, hd)
    v = (x @ p["wv"] + p["bv"][0]).reshape(B, T, nhead, hd)
    s = jnp.einsum("bqhd,bkhd->bhqk", q, k) * scale
    neg = jnp.where(mask > 0.5, 0.0, -1e30)
    s = s + neg[:, None, None, :]
    attn_w = jax.nn.softmax(s, axis=-1)
    attn = jnp.einsum("bhqk,bkhd->bqhd", attn_w, v).reshape(B, T, D)
    attn = attn @ p["wo"] + p["bo"][0]
    h1 = _ln(x + attn, p["g1"][0], p["be1"][0])
    ff = jnp.maximum(h1 @ p["w1"] + p["b1"][0], 0.0) @ p["w2"] + p["b2"][0]
    return _ln(h1 + ff, p["g2"][0], p["be2"][0])


def reference(x, temporal_mask, layer_params, nhead):
    B, T, D = x.shape
    x = x + sinusoidal_pe(T, D)[None]
    mask = temporal_mask.astype(jnp.float32)
    for p in layer_params:
        x = _layer_ref(x, mask, p, nhead)
    return x


# --------------------------------- main ------------------------------------ #

if __name__ == "__main__":
    B, T, D, H, F, L = 2, 8, 32, 4, 64, 2   # batch, num_frames, d_model, nhead, dim_ff, layers

    key = jax.random.PRNGKey(0)
    kx, kp = jax.random.split(key)
    x = jax.random.normal(kx, (B, T, D), dtype=jnp.float32)
    temporal_mask = jnp.ones((B, T), jnp.int32).at[1, 6:].set(0)   # pad last 2 frames of sample 1

    layers = init_params(kp, D, H, F, L)
    fused = prepare_fused_params(layers, H)          # one-time host-side weight prep

    out = temporal_transformer_encoder(x, temporal_mask, fused, H)
    out = jax.block_until_ready(out)

    ref = reference(x, temporal_mask, layers, H)
    err = float(jnp.max(jnp.abs(out - ref)))
    assert out.shape == (B, T, D), out.shape
    # Kernel uses bf16 MXU operands (f32 accumulate / softmax / LN) vs f32 reference.
    assert err < 5e-2, f"max abs err {err}"

    print("KERNEL_OK")
</pallas_src>

<mosaic_0001>
module attributes {stable_mosaic.version = 11 : i64} {
  func.func @_fused_encoder_kernel(%arg0: i32, %arg1: i32, %arg2: memref<1x8x32xf32, #tpu.memory_space<vmem>>, %arg3: memref<1x8x32xf32, #tpu.memory_space<vmem>>, %arg4: memref<1x1x8xf32, #tpu.memory_space<vmem>>, %arg5: memref<32x32xf32, #tpu.memory_space<vmem>>, %arg6: memref<1x32x32xbf16, #tpu.memory_space<vmem>>, %arg7: memref<1x1x32xf32, #tpu.memory_space<vmem>>, %arg8: memref<1x32x32xbf16, #tpu.memory_space<vmem>>, %arg9: memref<1x1x32xf32, #tpu.memory_space<vmem>>, %arg10: memref<1x32x32xbf16, #tpu.memory_space<vmem>>, %arg11: memref<1x1x32xf32, #tpu.memory_space<vmem>>, %arg12: memref<1x32x32xbf16, #tpu.memory_space<vmem>>, %arg13: memref<1x1x32xf32, #tpu.memory_space<vmem>>, %arg14: memref<1x1x32xf32, #tpu.memory_space<vmem>>, %arg15: memref<1x1x32xf32, #tpu.memory_space<vmem>>, %arg16: memref<1x32x64xbf16, #tpu.memory_space<vmem>>, %arg17: memref<1x1x64xf32, #tpu.memory_space<vmem>>, %arg18: memref<1x64x32xbf16, #tpu.memory_space<vmem>>, %arg19: memref<1x1x32xf32, #tpu.memory_space<vmem>>, %arg20: memref<1x1x32xf32, #tpu.memory_space<vmem>>, %arg21: memref<1x1x32xf32, #tpu.memory_space<vmem>>, %arg22: memref<1x8x32xf32, #tpu.memory_space<vmem>>, %arg23: memref<8x32xf32, #tpu.memory_space<vmem>>) attributes {dimension_semantics = [#tpu.dimension_semantics<parallel>, #tpu.dimension_semantics<arbitrary>], iteration_bounds = array<i64: 2, 2>, scalar_prefetch = 0 : i64, scratch_operands = 1 : i64, tpu.core_type = #tpu.core_type<tc>, window_params = [{transform_indices = @transform_0, window_bounds = array<i64: 1, 8, 32>}, {pipeline_mode = #tpu.pipeline_mode<synchronous>, transform_indices = @transform_1, window_bounds = array<i64: 1, 8, 32>}, {transform_indices = @transform_2, window_bounds = array<i64: 1, 1, 8>}, {pipeline_mode = #tpu.pipeline_mode<synchronous>, transform_indices = @transform_3, window_bounds = array<i64: 32, 32>}, {transform_indices = @transform_4, window_bounds = array<i64: 1, 32, 32>}, {transform_indices = @transform_5, window_bounds = array<i64: 1, 1, 32>}, {transform_indices = @transform_6, window_bounds = array<i64: 1, 32, 32>}, {transform_indices = @transform_7, window_bounds = array<i64: 1, 1, 32>}, {transform_indices = @transform_8, window_bounds = array<i64: 1, 32, 32>}, {transform_indices = @transform_9, window_bounds = array<i64: 1, 1, 32>}, {transform_indices = @transform_10, window_bounds = array<i64: 1, 32, 32>}, {transform_indices = @transform_11, window_bounds = array<i64: 1, 1, 32>}, {transform_indices = @transform_12, window_bounds = array<i64: 1, 1, 32>}, {transform_indices = @transform_13, window_bounds = array<i64: 1, 1, 32>}, {transform_indices = @transform_14, window_bounds = array<i64: 1, 32, 64>}, {transform_indices = @transform_15, window_bounds = array<i64: 1, 1, 64>}, {transform_indices = @transform_16, window_bounds = array<i64: 1, 64, 32>}, {transform_indices = @transform_17, window_bounds = array<i64: 1, 1, 32>}, {transform_indices = @transform_18, window_bounds = array<i64: 1, 1, 32>}, {transform_indices = @transform_19, window_bounds = array<i64: 1, 1, 32>}, {transform_indices = @transform_20, window_bounds = array<i64: 1, 8, 32>}]} {
    %c0_i32 = arith.constant 0 : i32
    %0 = arith.cmpi eq, %arg1, %c0_i32 : i32
    %1 = arith.extui %0 : i1 to i32
    %c0_i32_0 = arith.constant 0 : i32
    %2 = arith.cmpi ne, %1, %c0_i32_0 : i32
    scf.if %2 {
      %c0_80 = arith.constant 0 : index
      %c0_81 = arith.constant 0 : index
      %c0_82 = arith.constant 0 : index
      %147 = vector.load %arg2[%c0_80, %c0_81, %c0_82] : memref<1x8x32xf32, #tpu.memory_space<vmem>>, vector<1x8x32xf32>
      %c0_83 = arith.constant 0 : index
      %c0_84 = arith.constant 0 : index
      %c0_85 = arith.constant 0 : index
      %148 = vector.load %arg3[%c0_83, %c0_84, %c0_85] : memref<1x8x32xf32, #tpu.memory_space<vmem>>, vector<1x8x32xf32>
      %149 = arith.addf %147, %148 : vector<1x8x32xf32>
      %150 = vector.shape_cast %149 : vector<1x8x32xf32> to vector<8x32xf32>
      %c0_86 = arith.constant 0 : index
      %c0_87 = arith.constant 0 : index
      %151 = vector.load %arg23[%c0_86, %c0_87] : memref<8x32xf32, #tpu.memory_space<vmem>>, vector<8x32xf32>
      tpu.vector_store %arg23[%c0_86, %c0_87], %150 {strides = array<i32>} : memref<8x32xf32, #tpu.memory_space<vmem>>, vector<8x32xf32>,
    } else {
    }
    %c0 = arith.constant 0 : index
    %c0_1 = arith.constant 0 : index
    %3 = vector.load %arg23[%c0, %c0_1] : memref<8x32xf32, #tpu.memory_space<vmem>>, vector<8x32xf32>
    %4 = arith.truncf %3 : vector<8x32xf32> to vector<8x32xbf16>
    %c0_2 = arith.constant 0 : index
    %c0_3 = arith.constant 0 : index
    %c0_4 = arith.constant 0 : index
    %5 = vector.load %arg6[%c0_2, %c0_3, %c0_4] : memref<1x32x32xbf16, #tpu.memory_space<vmem>>, vector<1x32x32xbf16>
    %6 = vector.shape_cast %5 : vector<1x32x32xbf16> to vector<32x32xbf16>
    %cst = arith.constant dense<0.000000e+00> : vector<8x32xf32>
    %7 = tpu.matmul %4, %6, %cst {dimension_numbers = #tpu.dot_dimension_numbers<[1], [0], [0], [1], [0, 0, 1, 1], [], []>} : vector<8x32xbf16>, vector<32x32xbf16>, vector<8x32xf32> -> vector<8x32xf32>
    %c0_5 = arith.constant 0 : index
    %c0_6 = arith.constant 0 : index
    %c0_7 = arith.constant 0 : index
    %8 = vector.load %arg7[%c0_5, %c0_6, %c0_7] : memref<1x1x32xf32, #tpu.memory_space<vmem>>, vector<1x1x32xf32>
    %9 = vector.shape_cast %8 : vector<1x1x32xf32> to vector<1x32xf32>
    %10 = vector.broadcast %9 : vector<1x32xf32> to vector<8x32xf32>
    %11 = arith.addf %7, %10 : vector<8x32xf32>
    %c0_8 = arith.constant 0 : index
    %c0_9 = arith.constant 0 : index
    %c0_10 = arith.constant 0 : index
    %12 = vector.load %arg8[%c0_8, %c0_9, %c0_10] : memref<1x32x32xbf16, #tpu.memory_space<vmem>>, vector<1x32x32xbf16>
    %13 = vector.shape_cast %12 : vector<1x32x32xbf16> to vector<32x32xbf16>
    %cst_11 = arith.constant dense<0.000000e+00> : vector<8x32xf32>
    %14 = tpu.matmul %4, %13, %cst_11 {dimension_numbers = #tpu.dot_dimension_numbers<[1], [0], [0], [1], [0, 0, 1, 1], [], []>} : vector<8x32xbf16>, vector<32x32xbf16>, vector<8x32xf32> -> vector<8x32xf32>
    %c0_12 = arith.constant 0 : index
    %c0_13 = arith.constant 0 : index
    %c0_14 = arith.constant 0 : index
    %15 = vector.load %arg9[%c0_12, %c0_13, %c0_14] : memref<1x1x32xf32, #tpu.memory_space<vmem>>, vector<1x1x32xf32>
    %16 = vector.shape_cast %15 : vector<1x1x32xf32> to vector<1x32xf32>
    %17 = vector.broadcast %16 : vector<1x32xf32> to vector<8x32xf32>
    %18 = arith.addf %14, %17 : vector<8x32xf32>
    %c0_15 = arith.constant 0 : index
    %c0_16 = arith.constant 0 : index
    %c0_17 = arith.constant 0 : index
    %19 = vector.load %arg10[%c0_15, %c0_16, %c0_17] : memref<1x32x32xbf16, #tpu.memory_space<vmem>>, vector<1x32x32xbf16>
    %20 = vector.shape_cast %19 : vector<1x32x32xbf16> to vector<32x32xbf16>
    %cst_18 = arith.constant dense<0.000000e+00> : vector<8x32xf32>
    %21 = tpu.matmul %4, %20, %cst_18 {dimension_numbers = #tpu.dot_dimension_numbers<[1], [0], [0], [1], [0, 0, 1, 1], [], []>} : vector<8x32xbf16>, vector<32x32xbf16>, vector<8x32xf32> -> vector<8x32xf32>
    %c0_19 = arith.constant 0 : index
    %c0_20 = arith.constant 0 : index
    %c0_21 = arith.constant 0 : index
    %22 = vector.load %arg11[%c0_19, %c0_20, %c0_21] : memref<1x1x32xf32, #tpu.memory_space<vmem>>, vector<1x1x32xf32>
    %23 = vector.shape_cast %22 : vector<1x1x32xf32> to vector<1x32xf32>
    %24 = vector.broadcast %23 : vector<1x32xf32> to vector<8x32xf32>
    %25 = arith.addf %21, %24 : vector<8x32xf32>
    %26 = vector.shape_cast %11 : vector<8x32xf32> to vector<1x8x32xf32>
    %27 = vector.shape_cast %18 : vector<8x32xf32> to vector<1x8x32xf32>
    %28 = arith.truncf %27 : vector<1x8x32xf32> to vector<1x8x32xbf16>
    %29 = vector.shape_cast %25 : vector<8x32xf32> to vector<1x8x32xf32>
    %30 = arith.truncf %29 : vector<1x8x32xf32> to vector<1x8x32xbf16>
    %31 = tpu.concatenate %26, %26, %26, %26 in 1 : vector<1x8x32xf32>, vector<1x8x32xf32>, vector<1x8x32xf32>, vector<1x8x32xf32> -> vector<1x32x32xf32>
    %c0_22 = arith.constant 0 : index
    %c0_23 = arith.constant 0 : index
    %32 = vector.load %arg5[%c0_22, %c0_23] : memref<32x32xf32, #tpu.memory_space<vmem>>, vector<32x32xf32>
    %33 = vector.shape_cast %32 : vector<32x32xf32> to vector<1x32x32xf32>
    %34 = arith.mulf %31, %33 : vector<1x32x32xf32>
    %35 = arith.truncf %34 : vector<1x32x32xf32> to vector<1x32x32xbf16>
    "tpu.trace_start"() <{level = 10 : i32, message = "bqd,bkd->bqk"}> : () -> ()
    %cst_24 = arith.constant dense<0.000000e+00> : vector<1x32x8xf32>
    %36 = tpu.matmul %35, %28, %cst_24 {dimension_numbers = #tpu.dot_dimension_numbers<[2], [2], [1], [1], [0, 0, 0, 1, 1, 1], [0], [0]>} : vector<1x32x32xbf16>, vector<1x8x32xbf16>, vector<1x32x8xf32> -> vector<1x32x8xf32>
    "tpu.trace_stop"() : () -> ()
    %c0_25 = arith.constant 0 : index
    %c0_26 = arith.constant 0 : index
    %c0_27 = arith.constant 0 : index
    %37 = vector.load %arg4[%c0_25, %c0_26, %c0_27] : memref<1x1x8xf32, #tpu.memory_space<vmem>>, vector<1x1x8xf32>
    %38 = vector.broadcast %37 : vector<1x1x8xf32> to vector<1x32x8xf32>
    %39 = arith.addf %36, %38 : vector<1x32x8xf32>
    %cst_28 = arith.constant dense<0xFF800000> : vector<1x32xf32>
    %40 = vector.multi_reduction <maximumf>, %39, %cst_28 [2] : vector<1x32x8xf32> to vector<1x32xf32>
    %41 = vector.shape_cast %40 : vector<1x32xf32> to vector<1x32x1xf32>
    %42 = vector.broadcast %41 : vector<1x32x1xf32> to vector<1x32x8xf32>
    %43 = arith.subf %39, %42 : vector<1x32x8xf32>
    %44 = math.exp %43 : vector<1x32x8xf32>
    %cst_29 = arith.constant dense<0.000000e+00> : vector<1x32xf32>
    %45 = vector.multi_reduction <add>, %44, %cst_29 [2] : vector<1x32x8xf32> to vector<1x32xf32>
    %46 = vector.shape_cast %45 : vector<1x32xf32> to vector<1x32x1xf32>
    %47 = tpu.reciprocal %46 {approx = true} : vector<1x32x1xf32> -> vector<1x32x1xf32>
    %48 = vector.broadcast %47 : vector<1x32x1xf32> to vector<1x32x8xf32>
    %49 = arith.mulf %44, %48 : vector<1x32x8xf32>
    %50 = arith.truncf %49 : vector<1x32x8xf32> to vector<1x32x8xbf16>
    "tpu.trace_start"() <{level = 10 : i32, message = "bqk,bkd->bqd"}> : () -> ()
    %cst_30 = arith.constant dense<0.000000e+00> : vector<1x32x32xf32>
    %51 = tpu.matmul %50, %30, %cst_30 {dimension_numbers = #tpu.dot_dimension_numbers<[2], [1], [1], [2], [0, 0, 0, 1, 1, 2], [0], [0]>} : vector<1x32x8xbf16>, vector<1x8x32xbf16>, vector<1x32x32xf32> -> vector<1x32x32xf32>
    "tpu.trace_stop"() : () -> ()
    %c0_31 = arith.constant 0 : index
    %c0_32 = arith.constant 0 : index
    %52 = vector.load %arg5[%c0_31, %c0_32] : memref<32x32xf32, #tpu.memory_space<vmem>>, vector<32x32xf32>
    %53 = vector.shape_cast %52 : vector<32x32xf32> to vector<1x32x32xf32>
    %54 = arith.mulf %51, %53 : vector<1x32x32xf32>
    %55 = vector.extract_strided_slice %54 {offsets = [0, 0, 0], sizes = [1, 8, 32], strides = [1, 1, 1]} : vector<1x32x32xf32> to vector<1x8x32xf32>
    %56 = vector.extract_strided_slice %54 {offsets = [0, 8, 0], sizes = [1, 8, 32], strides = [1, 1, 1]} : vector<1x32x32xf32> to vector<1x8x32xf32>
    %57 = arith.addf %55, %56 : vector<1x8x32xf32>
    %58 = vector.extract_strided_slice %54 {offsets = [0, 16, 0], sizes = [1, 8, 32], strides = [1, 1, 1]} : vector<1x32x32xf32> to vector<1x8x32xf32>
    %59 = arith.addf %57, %58 : vector<1x8x32xf32>
    %60 = vector.extract_strided_slice %54 {offsets = [0, 24, 0], sizes = [1, 8, 32], strides = [1, 1, 1]} : vector<1x32x32xf32> to vector<1x8x32xf32>
    %61 = arith.addf %59, %60 : vector<1x8x32xf32>
    %62 = vector.shape_cast %61 : vector<1x8x32xf32> to vector<8x32xf32>
    %63 = arith.truncf %62 : vector<8x32xf32> to vector<8x32xbf16>
    %c0_33 = arith.constant 0 : index
    %c0_34 = arith.constant 0 : index
    %c0_35 = arith.constant 0 : index
    %64 = vector.load %arg12[%c0_33, %c0_34, %c0_35] : memref<1x32x32xbf16, #tpu.memory_space<vmem>>, vector<1x32x32xbf16>
    %65 = vector.shape_cast %64 : vector<1x32x32xbf16> to vector<32x32xbf16>
    %cst_36 = arith.constant dense<0.000000e+00> : vector<8x32xf32>
    %66 = tpu.matmul %63, %65, %cst_36 {dimension_numbers = #tpu.dot_dimension_numbers<[1], [0], [0], [1], [0, 0, 1, 1], [], []>} : vector<8x32xbf16>, vector<32x32xbf16>, vector<8x32xf32> -> vector<8x32xf32>
    %c0_37 = arith.constant 0 : index
    %c0_38 = arith.constant 0 : index
    %c0_39 = arith.constant 0 : index
    %67 = vector.load %arg13[%c0_37, %c0_38, %c0_39] : memref<1x1x32xf32, #tpu.memory_space<vmem>>, vector<1x1x32xf32>
    %68 = vector.shape_cast %67 : vector<1x1x32xf32> to vector<1x32xf32>
    %69 = vector.broadcast %68 : vector<1x32xf32> to vector<8x32xf32>
    %70 = arith.addf %66, %69 : vector<8x32xf32>
    %71 = arith.addf %3, %70 : vector<8x32xf32>
    %cst_40 = arith.constant dense<0.000000e+00> : vector<8xf32>
    %72 = vector.multi_reduction <add>, %71, %cst_40 [1] : vector<8x32xf32> to vector<8xf32>
    %73 = vector.shape_cast %72 : vector<8xf32> to vector<8x1xf32>
    %cst_41 = arith.constant 3.200000e+01 : f32
    %74 = vector.broadcast %cst_41 : f32 to vector<8x1xf32>
    %75 = arith.divf %73, %74 : vector<8x1xf32>
    %76 = vector.broadcast %75 : vector<8x1xf32> to vector<8x32xf32>
    %77 = arith.subf %71, %76 : vector<8x32xf32>
    %78 = arith.mulf %77, %77 : vector<8x32xf32>
    %cst_42 = arith.constant dense<0.000000e+00> : vector<8xf32>
    %79 = vector.multi_reduction <add>, %78, %cst_42 [1] : vector<8x32xf32> to vector<8xf32>
    %80 = vector.shape_cast %79 : vector<8xf32> to vector<8x1xf32>
    %cst_43 = arith.constant 3.200000e+01 : f32
    %81 = vector.broadcast %cst_43 : f32 to vector<8x1xf32>
    %82 = arith.divf %80, %81 : vector<8x1xf32>
    %83 = vector.broadcast %75 : vector<8x1xf32> to vector<8x32xf32>
    %84 = arith.subf %71, %83 : vector<8x32xf32>
    %cst_44 = arith.constant 9.99999974E-6 : f32
    %85 = vector.broadcast %cst_44 : f32 to vector<8x1xf32>
    %86 = arith.addf %82, %85 : vector<8x1xf32>
    %87 = math.rsqrt %86 : vector<8x1xf32>
    %88 = vector.broadcast %87 : vector<8x1xf32> to vector<8x32xf32>
    %89 = arith.mulf %84, %88 : vector<8x32xf32>
    %c0_45 = arith.constant 0 : index
    %c0_46 = arith.constant 0 : index
    %c0_47 = arith.constant 0 : index
    %90 = vector.load %arg14[%c0_45, %c0_46, %c0_47] : memref<1x1x32xf32, #tpu.memory_space<vmem>>, vector<1x1x32xf32>
    %91 = vector.shape_cast %90 : vector<1x1x32xf32> to vector<1x32xf32>
    %92 = vector.broadcast %91 : vector<1x32xf32> to vector<8x32xf32>
    %93 = arith.mulf %89, %92 : vector<8x32xf32>
    %c0_48 = arith.constant 0 : index
    %c0_49 = arith.constant 0 : index
    %c0_50 = arith.constant 0 : index
    %94 = vector.load %arg15[%c0_48, %c0_49, %c0_50] : memref<1x1x32xf32, #tpu.memory_space<vmem>>, vector<1x1x32xf32>
    %95 = vector.shape_cast %94 : vector<1x1x32xf32> to vector<1x32xf32>
    %96 = vector.broadcast %95 : vector<1x32xf32> to vector<8x32xf32>
    %97 = arith.addf %93, %96 : vector<8x32xf32>
    %98 = arith.truncf %97 : vector<8x32xf32> to vector<8x32xbf16>
    %c0_51 = arith.constant 0 : index
    %c0_52 = arith.constant 0 : index
    %c0_53 = arith.constant 0 : index
    %99 = vector.load %arg16[%c0_51, %c0_52, %c0_53] : memref<1x32x64xbf16, #tpu.memory_space<vmem>>, vector<1x32x64xbf16>
    %100 = vector.shape_cast %99 : vector<1x32x64xbf16> to vector<32x64xbf16>
    %cst_54 = arith.constant dense<0.000000e+00> : vector<8x64xf32>
    %101 = tpu.matmul %98, %100, %cst_54 {dimension_numbers = #tpu.dot_dimension_numbers<[1], [0], [0], [1], [0, 0, 1, 1], [], []>} : vector<8x32xbf16>, vector<32x64xbf16>, vector<8x64xf32> -> vector<8x64xf32>
    %c0_55 = arith.constant 0 : index
    %c0_56 = arith.constant 0 : index
    %c0_57 = arith.constant 0 : index
    %102 = vector.load %arg17[%c0_55, %c0_56, %c0_57] : memref<1x1x64xf32, #tpu.memory_space<vmem>>, vector<1x1x64xf32>
    %103 = vector.shape_cast %102 : vector<1x1x64xf32> to vector<1x64xf32>
    %104 = vector.broadcast %103 : vector<1x64xf32> to vector<8x64xf32>
    %105 = arith.addf %101, %104 : vector<8x64xf32>
    %cst_58 = arith.constant 0.000000e+00 : f32
    %106 = vector.broadcast %cst_58 : f32 to vector<8x64xf32>
    %107 = arith.maximumf %105, %106 : vector<8x64xf32>
    %108 = arith.truncf %107 : vector<8x64xf32> to vector<8x64xbf16>
    %c0_59 = arith.constant 0 : index
    %c0_60 = arith.constant 0 : index
    %c0_61 = arith.constant 0 : index
    %109 = vector.load %arg18[%c0_59, %c0_60, %c0_61] : memref<1x64x32xbf16, #tpu.memory_space<vmem>>, vector<1x64x32xbf16>
    %110 = vector.shape_cast %109 : vector<1x64x32xbf16> to vector<64x32xbf16>
    %cst_62 = arith.constant dense<0.000000e+00> : vector<8x32xf32>
    %111 = tpu.matmul %108, %110, %cst_62 {dimension_numbers = #tpu.dot_dimension_numbers<[1], [0], [0], [1], [0, 0, 1, 1], [], []>} : vector<8x64xbf16>, vector<64x32xbf16>, vector<8x32xf32> -> vector<8x32xf32>
    %c0_63 = arith.constant 0 : index
    %c0_64 = arith.constant 0 : index
    %c0_65 = arith.constant 0 : index
    %112 = vector.load %arg19[%c0_63, %c0_64, %c0_65] : memref<1x1x32xf32, #tpu.memory_space<vmem>>, vector<1x1x32xf32>
    %113 = vector.shape_cast %112 : vector<1x1x32xf32> to vector<1x32xf32>
    %114 = vector.broadcast %113 : vector<1x32xf32> to vector<8x32xf32>
    %115 = arith.addf %111, %114 : vector<8x32xf32>
    %116 = arith.addf %97, %115 : vector<8x32xf32>
    %cst_66 = arith.constant dense<0.000000e+00> : vector<8xf32>
    %117 = vector.multi_reduction <add>, %116, %cst_66 [1] : vector<8x32xf32> to vector<8xf32>
    %118 = vector.shape_cast %117 : vector<8xf32> to vector<8x1xf32>
    %cst_67 = arith.constant 3.200000e+01 : f32
    %119 = vector.broadcast %cst_67 : f32 to vector<8x1xf32>
    %120 = arith.divf %118, %119 : vector<8x1xf32>
    %121 = vector.broadcast %120 : vector<8x1xf32> to vector<8x32xf32>
    %122 = arith.subf %116, %121 : vector<8x32xf32>
    %123 = arith.mulf %122, %122 : vector<8x32xf32>
    %cst_68 = arith.constant dense<0.000000e+00> : vector<8xf32>
    %124 = vector.multi_reduction <add>, %123, %cst_68 [1] : vector<8x32xf32> to vector<8xf32>
    %125 = vector.shape_cast %124 : vector<8xf32> to vector<8x1xf32>
    %cst_69 = arith.constant 3.200000e+01 : f32
    %126 = vector.broadcast %cst_69 : f32 to vector<8x1xf32>
    %127 = arith.divf %125, %126 : vector<8x1xf32>
    %128 = vector.broadcast %120 : vector<8x1xf32> to vector<8x32xf32>
    %129 = arith.subf %116, %128 : vector<8x32xf32>
    %cst_70 = arith.constant 9.99999974E-6 : f32
    %130 = vector.broadcast %cst_70 : f32 to vector<8x1xf32>
    %131 = arith.addf %127, %130 : vector<8x1xf32>
    %132 = math.rsqrt %131 : vector<8x1xf32>
    %133 = vector.broadcast %132 : vector<8x1xf32> to vector<8x32xf32>
    %134 = arith.mulf %129, %133 : vector<8x32xf32>
    %c0_71 = arith.constant 0 : index
    %c0_72 = arith.constant 0 : index
    %c0_73 = arith.constant 0 : index
    %135 = vector.load %arg20[%c0_71, %c0_72, %c0_73] : memref<1x1x32xf32, #tpu.memory_space<vmem>>, vector<1x1x32xf32>
    %136 = vector.shape_cast %135 : vector<1x1x32xf32> to vector<1x32xf32>
    %137 = vector.broadcast %136 : vector<1x32xf32> to vector<8x32xf32>
    %138 = arith.mulf %134, %137 : vector<8x32xf32>
    %c0_74 = arith.constant 0 : index
    %c0_75 = arith.constant 0 : index
    %c0_76 = arith.constant 0 : index
    %139 = vector.load %arg21[%c0_74, %c0_75, %c0_76] : memref<1x1x32xf32, #tpu.memory_space<vmem>>, vector<1x1x32xf32>
    %140 = vector.shape_cast %139 : vector<1x1x32xf32> to vector<1x32xf32>
    %141 = vector.broadcast %140 : vector<1x32xf32> to vector<8x32xf32>
    %142 = arith.addf %138, %141 : vector<8x32xf32>
    %c0_77 = arith.constant 0 : index
    %c0_78 = arith.constant 0 : index
    %143 = vector.load %arg23[%c0_77, %c0_78] : memref<8x32xf32, #tpu.memory_space<vmem>>, vector<8x32xf32>
    tpu.vector_store %arg23[%c0_77, %c0_78], %142 {strides = array<i32>} : memref<8x32xf32, #tpu.memory_space<vmem>>, vector<8x32xf32>,
    %c1_i32 = arith.constant 1 : i32
    %144 = arith.cmpi eq, %arg1, %c1_i32 : i32
    %145 = arith.extui %144 : i1 to i32
    %c0_i32_79 = arith.constant 0 : i32
    %146 = arith.cmpi ne, %145, %c0_i32_79 : i32
    scf.if %146 {
      %147 = vector.shape_cast %142 : vector<8x32xf32> to vector<1x8x32xf32>
      %c0_80 = arith.constant 0 : index
      %c0_81 = arith.constant 0 : index
      %c0_82 = arith.constant 0 : index
      %148 = vector.load %arg22[%c0_80, %c0_81, %c0_82] : memref<1x8x32xf32, #tpu.memory_space<vmem>>, vector<1x8x32xf32>
      tpu.vector_store %arg22[%c0_80, %c0_81, %c0_82], %147 {strides = array<i32>} : memref<1x8x32xf32, #tpu.memory_space<vmem>>, vector<1x8x32xf32>,
    } else {
    }
    return
  }
  func.func @transform_0(%arg0: i32, %arg1: i32) -> (i32, i32, i32) {
    %c0_i32 = arith.constant 0 : i32
    %c0_i32_0 = arith.constant 0 : i32
    %c0_i32_1 = arith.constant 0 : i32
    return %arg0, %c0_i32, %c0_i32_0 : i32, i32, i32
  }
  func.func @transform_1(%arg0: i32, %arg1: i32) -> (i32, i32, i32) {
    %c0_i32 = arith.constant 0 : i32
    %c0_i32_0 = arith.constant 0 : i32
    %c0_i32_1 = arith.constant 0 : i32
    %c0_i32_2 = arith.constant 0 : i32
    return %c0_i32, %c0_i32_0, %c0_i32_1 : i32, i32, i32
  }
  func.func @transform_2(%arg0: i32, %arg1: i32) -> (i32, i32, i32) {
    %c0_i32 = arith.constant 0 : i32
    %c0_i32_0 = arith.constant 0 : i32
    %c0_i32_1 = arith.constant 0 : i32
    return %arg0, %c0_i32, %c0_i32_0 : i32, i32, i32
  }
  func.func @transform_3(%arg0: i32, %arg1: i32) -> (i32, i32) {
    %c0_i32 = arith.constant 0 : i32
    %c0_i32_0 = arith.constant 0 : i32
    %c0_i32_1 = arith.constant 0 : i32
    return %c0_i32, %c0_i32_0 : i32, i32
  }
  func.func @transform_4(%arg0: i32, %arg1: i32) -> (i32, i32, i32) {
    %c0_i32 = arith.constant 0 : i32
    %c0_i32_0 = arith.constant 0 : i32
    %c0_i32_1 = arith.constant 0 : i32
    return %arg1, %c0_i32, %c0_i32_0 : i32, i32, i32
  }
  func.func @transform_5(%arg0: i32, %arg1: i32) -> (i32, i32, i32) {
    %c0_i32 = arith.constant 0 : i32
    %c0_i32_0 = arith.constant 0 : i32
    %c0_i32_1 = arith.constant 0 : i32
    return %arg1, %c0_i32, %c0_i32_0 : i32, i32, i32
  }
  func.func @transform_6(%arg0: i32, %arg1: i32) -> (i32, i32, i32) {
    %c0_i32 = arith.constant 0 : i32
    %c0_i32_0 = arith.constant 0 : i32
    %c0_i32_1 = arith.constant 0 : i32
    return %arg1, %c0_i32, %c0_i32_0 : i32, i32, i32
  }
  func.func @transform_7(%arg0: i32, %arg1: i32) -> (i32, i32, i32) {
    %c0_i32 = arith.constant 0 : i32
    %c0_i32_0 = arith.constant 0 : i32
    %c0_i32_1 = arith.constant 0 : i32
    return %arg1, %c0_i32, %c0_i32_0 : i32, i32, i32
  }
  func.func @transform_8(%arg0: i32, %arg1: i32) -> (i32, i32, i32) {
    %c0_i32 = arith.constant 0 : i32
    %c0_i32_0 = arith.constant 0 : i32
    %c0_i32_1 = arith.constant 0 : i32
    return %arg1, %c0_i32, %c0_i32_0 : i32, i32, i32
  }
  func.func @transform_9(%arg0: i32, %arg1: i32) -> (i32, i32, i32) {
    %c0_i32 = arith.constant 0 : i32
    %c0_i32_0 = arith.constant 0 : i32
    %c0_i32_1 = arith.constant 0 : i32
    return %arg1, %c0_i32, %c0_i32_0 : i32, i32, i32
  }
  func.func @transform_10(%arg0: i32, %arg1: i32) -> (i32, i32, i32) {
    %c0_i32 = arith.constant 0 : i32
    %c0_i32_0 = arith.constant 0 : i32
    %c0_i32_1 = arith.constant 0 : i32
    return %arg1, %c0_i32, %c0_i32_0 : i32, i32, i32
  }
  func.func @transform_11(%arg0: i32, %arg1: i32) -> (i32, i32, i32) {
    %c0_i32 = arith.constant 0 : i32
    %c0_i32_0 = arith.constant 0 : i32
    %c0_i32_1 = arith.constant 0 : i32
    return %arg1, %c0_i32, %c0_i32_0 : i32, i32, i32
  }
  func.func @transform_12(%arg0: i32, %arg1: i32) -> (i32, i32, i32) {
    %c0_i32 = arith.constant 0 : i32
    %c0_i32_0 = arith.constant 0 : i32
    %c0_i32_1 = arith.constant 0 : i32
    return %arg1, %c0_i32, %c0_i32_0 : i32, i32, i32
  }
  func.func @transform_13(%arg0: i32, %arg1: i32) -> (i32, i32, i32) {
    %c0_i32 = arith.constant 0 : i32
    %c0_i32_0 = arith.constant 0 : i32
    %c0_i32_1 = arith.constant 0 : i32
    return %arg1, %c0_i32, %c0_i32_0 : i32, i32, i32
  }
  func.func @transform_14(%arg0: i32, %arg1: i32) -> (i32, i32, i32) {
    %c0_i32 = arith.constant 0 : i32
    %c0_i32_0 = arith.constant 0 : i32
    %c0_i32_1 = arith.constant 0 : i32
    return %arg1, %c0_i32, %c0_i32_0 : i32, i32, i32
  }
  func.func @transform_15(%arg0: i32, %arg1: i32) -> (i32, i32, i32) {
    %c0_i32 = arith.constant 0 : i32
    %c0_i32_0 = arith.constant 0 : i32
    %c0_i32_1 = arith.constant 0 : i32
    return %arg1, %c0_i32, %c0_i32_0 : i32, i32, i32
  }
  func.func @transform_16(%arg0: i32, %arg1: i32) -> (i32, i32, i32) {
    %c0_i32 = arith.constant 0 : i32
    %c0_i32_0 = arith.constant 0 : i32
    %c0_i32_1 = arith.constant 0 : i32
    return %arg1, %c0_i32, %c0_i32_0 : i32, i32, i32
  }
  func.func @transform_17(%arg0: i32, %arg1: i32) -> (i32, i32, i32) {
    %c0_i32 = arith.constant 0 : i32
    %c0_i32_0 = arith.constant 0 : i32
    %c0_i32_1 = arith.constant 0 : i32
    return %arg1, %c0_i32, %c0_i32_0 : i32, i32, i32
  }
  func.func @transform_18(%arg0: i32, %arg1: i32) -> (i32, i32, i32) {
    %c0_i32 = arith.constant 0 : i32
    %c0_i32_0 = arith.constant 0 : i32
    %c0_i32_1 = arith.constant 0 : i32
    return %arg1, %c0_i32, %c0_i32_0 : i32, i32, i32
  }
  func.func @transform_19(%arg0: i32, %arg1: i32) -> (i32, i32, i32) {
    %c0_i32 = arith.constant 0 : i32
    %c0_i32_0 = arith.constant 0 : i32
    %c0_i32_1 = arith.constant 0 : i32
    return %arg1, %c0_i32, %c0_i32_0 : i32, i32, i32
  }
  func.func @transform_20(%arg0: i32, %arg1: i32) -> (i32, i32, i32) {
    %c0_i32 = arith.constant 0 : i32
    %c0_i32_0 = arith.constant 0 : i32
    %c0_i32_1 = arith.constant 0 : i32
    return %arg0, %c0_i32, %c0_i32_0 : i32, i32, i32
  }
}

</mosaic_0001>

<bundles_post_ra>
// kernel: tpu_custom_call.1
= control target key start
LH: loop header
LB: loop body
LE: loop exit
PB: predicated region body
PF: predicated region fallthrough
CT: control target
= control target key end

     0   :  { %s3358_s0 = inlined_call_operand.hbm [shape: f32[2,8,32], index: 0, kind: input, shape index: {}]   ;;  %s3359_s1 = inlined_call_operand.hbm [shape: f32[1,8,32], index: 1, kind: input, shape index: {}]   ;;  %s3360_s2 = inlined_call_operand.vmem [shape: f32[2,1,8], index: 2, kind: input, shape index: {}]   ;;  %s3361_s3 = inlined_call_operand.vmem [shape: f32[32,32], index: 3, kind: input, shape index: {}]   ;;  %s3362_s4 = inlined_call_operand.vmem [shape: bf16[2,32,32], index: 4, kind: input, shape index: {}]   ;;  %s3363_s5 = inlined_call_operand.vmem [shape: f32[2,1,32], index: 5, kind: input, shape index: {}]   ;;  %s3364_s6 = inlined_call_operand.vmem [shape: bf16[2,32,32], index: 6, kind: input, shape index: {}]   ;;  %s3365_s7 = inlined_call_operand.vmem [shape: f32[2,1,32], index: 7, kind: input, shape index: {}]   ;;  %s3366_s8 = inlined_call_operand.hbm [shape: bf16[2,32,32], index: 8, kind: input, shape index: {}]   ;;  %s3367_s9 = inlined_call_operand.vmem [shape: f32[2,1,32], index: 9, kind: input, shape index: {}]   ;;  %s3368_s10 = inlined_call_operand.hbm [shape: bf16[2,32,32], index: 10, kind: input, shape index: {}]   ;;  %s3369_s11 = inlined_call_operand.vmem [shape: f32[2,1,32], index: 11, kind: input, shape index: {}]   ;;  %s3370_s12 = inlined_call_operand.vmem [shape: f32[2,1,32], index: 12, kind: input, shape index: {}]   ;;  %s3371_s13 = inlined_call_operand.vmem [shape: f32[2,1,32], index: 13, kind: input, shape index: {}]   ;;  %s3372_s14 = inlined_call_operand.hbm [shape: bf16[2,32,64], index: 14, kind: input, shape index: {}]   ;;  %s3373_s15 = inlined_call_operand.vmem [shape: f32[2,1,64], index: 15, kind: input, shape index: {}]   ;;  %s3374_s16 = inlined_call_operand.vmem [shape: bf16[2,64,32], index: 16, kind: input, shape index: {}]   ;;  %s3375_s17 = inlined_call_operand.vmem [shape: f32[2,1,32], index: 17, kind: input, shape index: {}]   ;;  %s3376_s18 = inlined_call_operand.vmem [shape: f32[2,1,32], index: 18, kind: input, shape index: {}]   ;;  %s3377_s19 = inlined_call_operand.vmem [shape: f32[2,1,32], index: 19, kind: input, shape index: {}]   ;;  %s3378_s20 = inlined_call_operand.hbm [shape: f32[2,8,32], index: 20, kind: output, shape index: {}]  }
   0x1   :  { %3409 = sst [smem:[#allocation30_spill]] %s3358_s0 }
   0x2   :  { %3410 = sst [smem:[#allocation31_spill]] %s3359_s1 }
   0x3   :  { %3411 = sst [smem:[#allocation32_spill]] %s3360_s2 }
   0x4   :  { %3412 = sst [smem:[#allocation33_spill]] %s3361_s3 }
   0x5   :  { %3413 = sst [smem:[#allocation34_spill]] %s3362_s4 }
   0x6   :  { %3414 = sst [smem:[#allocation35_spill]] %s3364_s6 }
   0x7   :  { %3415 = sst [smem:[#allocation36_spill]] %s3365_s7 }
   0x8   :  { %3416 = sst [smem:[#allocation37_spill]] %s3366_s8 }
   0x9   :  { %3417 = sst [smem:[#allocation38_spill]] %s3367_s9 }
   0xa   :  { %3418 = sst [smem:[#allocation39_spill]] %s3368_s10 }
   0xb   :  { %3419 = sst [smem:[#allocation40_spill]] %s3369_s11 }
   0xc   :  { %3420 = sst [smem:[#allocation41_spill]] %s3370_s12 }
   0xd   :  { %3421 = sst [smem:[#allocation42_spill]] %s3371_s13 }
   0xe   :  { %3422 = sst [smem:[#allocation43_spill]] %s3372_s14 }
   0xf   :  { %3423 = sst [smem:[#allocation44_spill]] %s3373_s15 }
  0x10   :  { %3424 = sst [smem:[#allocation45_spill]] %s3374_s16 }
  0x11   :  { %3425 = sst [smem:[#allocation46_spill]] %s3375_s17 }
  0x12   :  { %3426 = sst [smem:[#allocation47_spill]] %s3376_s18 }
  0x13   :  { %3427 = sst [smem:[#allocation48_spill]] %s3377_s19 }
  0x14   :  { %3428 = sst [smem:[#allocation49_spill]] %s3378_s20 }
  0x15   :  { %25 = vsyncpa [#allocation4], 0 }
  0x16   :  { %27 = vsyncpa [#allocation4 + $0x1], 0 }
  0x17   :  { %28 = vsyncpa [#allocation7], 0 }
  0x18   :  { %29 = vsyncpa [#allocation5], 0 }
  0x19   :  { %31 = vsyncpa [#allocation5 + $0x1], 0  ;;  %s2709_s1 = smov 0   ;;  %s2711_s22 = smov 0  }
  0x1a   :  { %s2713_s23 = smov 0   ;;  %s2715_s24 = smov 0  }
  0x1b   :  { %s2717_s2 = smov 0   ;;  %s2719_s25 = smov 0  }
  0x1c   :  { %s2721_s3 = smov 0   ;;  %s2723_s26 = smov 0  }
  0x1d   :  { %s2725_s27 = smov 0   ;;  %s2727_s28 = smov 0  }
  0x1e   :  { %s2729_s4 = smov 0  }
  0x1f LB: > { %3429 = sst [smem:[#allocation16_spill]] %s2556_s22  ;;  %s46_s29 = sadd.s32 1, %s2584_s27  ;;  %s2592_s4 = sphi %s2729_s4, %s37_s4   ;;  %s2588_s28 = sphi %s2727_s28, %s3519_s28   ;;  %s2584_s27 = sphi %s2725_s27, %s3518_s27   ;;  %s2580_s26 = sphi %s2723_s26, %s3517_s26   ;;  %s2576_s3 = sphi %s2721_s3, %s3516_s3   ;;  %s2572_s25 = sphi %s2719_s25, %s3515_s25   ;;  %s2568_s2 = sphi %s2717_s2, %s3514_s2   ;;  %s2564_s24 = sphi %s2715_s24, %s3513_s24   ;;  %s2560_s23 = sphi %s2713_s23, %s3512_s23   ;;  %s2556_s22 = sphi %s2711_s22, %s3511_s22   ;;  %s2552_s1 = sphi %s2709_s1, %s3510_s1  }
  0x20   : > { %3430 = sst [smem:[#allocation17_spill]] %s2560_s23  ;;  %s49_s30 = sadd.s32 1, %s2588_s28 }
  0x21   : > { %3431 = sst [smem:[#allocation18_spill]] %s2564_s24  ;;  %p47_p0 = scmp.ge.s32.totalorder %s46_s29, 2 }
  0x22   : > { %3432 = sst [smem:[#allocation19_spill]] %s2568_s2  ;;  %s56_s0 = sadd.s32 1, %s2572_s25 }
  0x23   : > { %3433 = sst [smem:[#allocation20_spill]] %s2572_s25  ;;  %p3385_p1 = scmp.ne.s32.totalorder %s2572_s25, %s2568_s2 }
  0x24   : > { %3434 = sst [smem:[#allocation21_spill]] %s2584_s27  ;;  %p64_p2 = scmp.eq.s32.totalorder %s2592_s4, 0 }
  0x25   : > { %3435 = sst [smem:[#allocation22_spill]] %s2588_s28  ;;  %s3521_s29 = smov (%p47_p0, %s46_s29), 0 }
  0x26   : > { %3436 = sst [smem:[#allocation23_spill]] %s2592_s4  ;;  %s3523_s30 = smov (!%p47_p0, %s49_s30), %s2588_s28 }
  0x27   : > { %3437 = sst [smem:[#allocation24_spill]] %s3521_s29  ;;  %p2776_p3 = por %p64_p2, %p3385_p1 }
  0x28   : > { %s251_s20 = ssub.s32 %s2584_s27, %s3521_s29  ;;  %p51_p4 = scmp.ge.s32.totalorder %s3523_s30, 2 }
  0x29   : > { %p252_p5 = scmp.eq.s32.totalorder %s251_s20, 0  ;;  %s254_s19 = sadd.s32 1, %s2560_s23 }
  0x2a   : > { %p261_p6 = scmp.ne.s32.totalorder %s2560_s23, %s2556_s22  ;;  %s3525_s30 = smov (%p51_p4, %s3523_s30), 0 }
  0x2b   : > { %3439 = sst [smem:[#allocation25_spill]] %s3525_s30  ;;  %s53_s16 = ssub.s32 %s2588_s28, %s3525_s30 }
  0x2c   : > { %s2788_s18 = scalar_select %p252_p5, %s2560_s23, %s254_s19  }
  0x2d   : > { %p2792_p7 = por %p261_p6, %p64_p2  ;;  %p54_p8 = scmp.eq.s32.totalorder %s53_s16, 0 }
  0x2e   : > { %3440 = sst [smem:[#allocation26_spill]] %s2788_s18  ;;  %p2184_p9 = scmp.lt.s32.totalorder %s2592_s4, 4 }
  0x2f   : > { %s617_s29 = sand.u32 1, %s2592_s4   ;;  %s619_s20 = sand.u32 1, %s2572_s25  }
  0x30   : > { %s2799_s15 = scalar_select %p54_p8, %s2572_s25, %s56_s0  }
  0x31   : > { %s1985_s13 = sshll.u32 %s619_s20, 3  ;;  %s1986_s12 = sshll.u32 %s2588_s28, 7 }
  0x32   : > { %3442 = sst [smem:[#allocation27_spill]] %s2799_s15  ;;  %s3443_s7 = sld [smem:[#allocation30_spill]] }
  0x33   : > { %s621_s30 = scalar_lea.vmem [#allocation3], %s1985_s13  ;;  %p2810_p10 = pnand %p2184_p9, %p2776_p3 }
  0x34   : > { %s628_s18 = sshll.u32 %s621_s30, 4  ;;  %p2818_p11 = pnand %p2184_p9, %p2792_p7  ;;  %s2814_s18 = int_to_ptr.vmem [resolvable:$true] %s628_s18 }
  0x35   : > { %s671_s11 = sand.u32 1, %s2560_s23   ;;  %p2316_p13 = pneg %p2810_p10 }
  0x36   : > { %s3445_s9 = scalar_select %p2818_p11, 1, 0 }
  0x38   : > { %s2806_s19 = scalar_lea.hbm %s3443_s7, %s1986_s12  ;;  %s2823_s12 = scalar_lea.sflag [#allocation4], %s617_s29 }
  0x39   : > { %s2314_s13 = scalar_lea.hbm %s2806_s19, 128  ;;  %s2319_s21 = scalar_lea.hbm %s3443_s7, 256 }
  0x3a   : > { %p2315_p12 = scmp.ne.s32.totalorder %s2806_s19, %s2314_s13  ;;  %p2320_p3 = scmp.lt.u32.totalorder %s2806_s19, %s3443_s7 }
  0x3b   : > { %p2321_p4 = scmp.lt.u32.totalorder %s2319_s21, %s2314_s13  ;;  %p2323_p6 = scmp.lt.u32.totalorder %s2314_s13, %s2806_s19 }
  0x3c   : > { %p2317_p0 = pnand %p2316_p13, %p2315_p12 }
  0x3d   : > { %p2322_p5 = por %p2321_p4, %p2320_p3 }
  0x3e   : > { %p2318_p2 = pneg %p2317_p0 }
  0x3f   : > { %p2324_p7 = por %p2323_p6, %p2322_p5 }
  0x41   : > { %p2325_p8 = pnand %p2324_p7, %p2318_p2 }
  0x43   : > { %2328 = shalt.err (!%p2325_p8)
}
  0x44   : > { %s2329_s29 = scalar_lea.vmem %s2814_s18, 128  ;;  %s2594_s30 = smov [#allocation3]  }
  0x45   : > { %p2330_p9 = scmp.ne.s32.totalorder %s2814_s18, %s2329_s29  ;;  %s2334_s0 = sshll.u32 %s2594_s30, 4  ;;  %s2335_s0 = int_to_ptr.vmem [resolvable:$false] %s2334_s0 }
  0x46   : > { %s2336_s17 = scalar_lea.vmem %s2335_s0, 256  ;;  %p2337_p1 = scmp.lt.s32.totalorder %s2814_s18, %s2335_s0 }
  0x47   : > { %p2332_p12 = pnand %p2330_p9, %p2316_p13  ;;  %p2338_p3 = scmp.lt.s32.totalorder %s2336_s17, %s2329_s29 }
  0x49   : > { %p2333_p0 = pneg %p2332_p12  ;;  %p2339_p4 = por %p2338_p3, %p2337_p1 }
  0x4b   : > { %p2340_p5 = pnand %p2339_p4, %p2333_p0 }
  0x4d   : > { %2343 = shalt.err (!%p2340_p5)
}
  0x4e   : > { %2169 = dma.hbm_to_vmem [thread:$0]  (!%p2810_p10), %s2806_s19, 128, %s2814_s18, %s2823_s12  }
  0x4f   : > { %s2853_s13 = sshll.u32 %s671_s11, 4  ;;  %s2856_s21 = sshll.u32 %s2584_s27, 8 }
  0x50   : > { %s3446_s8 = sld [smem:[#allocation37_spill]]  ;;  %s673_s16 = scalar_lea.vmem [#allocation8], %s2853_s13 }
  0x51   : > { %s680_s0 = sshll.u32 %s673_s16, 4  ;;  %p2871_p10 = pneg %p2818_p11  ;;  %s2865_s0 = int_to_ptr.vmem [resolvable:$true] %s680_s0 }
  0x56   : > { %s2862_s30 = scalar_lea.hbm %s3446_s8, %s2856_s21  ;;  %s2349_s20 = scalar_lea.hbm %s3446_s8, 512 }
  0x57   : > { %s2344_s18 = scalar_lea.hbm %s2862_s30, 256  ;;  %p2350_p6 = scmp.lt.u32.totalorder %s2862_s30, %s3446_s8 }
  0x58   : > { %p2345_p1 = scmp.ne.s32.totalorder %s2862_s30, %s2344_s18  ;;  %p2351_p7 = scmp.lt.u32.totalorder %s2349_s20, %s2344_s18 }
  0x59   : > { %p2353_p9 = scmp.lt.u32.totalorder %s2344_s18, %s2862_s30 }
  0x5a   : > { %p2347_p13 = pnand %p2871_p10, %p2345_p1  ;;  %p2352_p8 = por %p2351_p7, %p2350_p6 }
  0x5c   : > { %p2348_p2 = pneg %p2347_p13  ;;  %p2354_p12 = por %p2353_p9, %p2352_p8 }
  0x5e   : > { %p2355_p0 = pnand %p2354_p12, %p2348_p2 }
  0x60   : > { %2358 = shalt.err (!%p2355_p0)
}
  0x61   : > { %s2359_s16 = scalar_lea.vmem %s2865_s0, 256  ;;  %s2595_s11 = smov [#allocation8]  }
  0x62   : > { %p2360_p3 = scmp.ne.s32.totalorder %s2865_s0, %s2359_s16  ;;  %s2364_s17 = sshll.u32 %s2595_s11, 4  ;;  %s2365_s17 = int_to_ptr.vmem [resolvable:$false] %s2364_s17 }
  0x63   : > { %s2366_s7 = scalar_lea.vmem %s2365_s17, 512  ;;  %p2367_p1 = scmp.lt.s32.totalorder %s2865_s0, %s2365_s17 }
  0x64   : > { %p2362_p4 = pnand %p2360_p3, %p2871_p10  ;;  %p2368_p13 = scmp.lt.s32.totalorder %s2366_s7, %s2359_s16 }
  0x66   : > { %p2363_p5 = pneg %p2362_p4  ;;  %p2369_p6 = por %p2368_p13, %p2367_p1 }
  0x68   : > { %p2370_p7 = pnand %p2369_p6, %p2363_p5 }
  0x6a   : > { %2373 = shalt.err (!%p2370_p7)
}
  0x6b   : > { %s3389_s18 = smov 64   ;;  %s3390_s20 = smov 4  }
  0x6c   : > { %2172 = dma.hbm_to_vmem [thread:$0]  (!%p2818_p11), %s2862_s30, 256, %s2865_s0, %s2823_s12, %s3389_s18, %s3389_s18, %s3390_s20  }
  0x6d   : > { %s3448_s10 = sld [smem:[#allocation39_spill]]  ;;  %s700_s17 = scalar_lea.vmem [#allocation9], %s2853_s13 }
  0x6e   : > { %s707_s7 = sshll.u32 %s700_s17, 4  ;;  %s2905_s7 = int_to_ptr.vmem [resolvable:$true] %s707_s7 }
  0x73   : > { %s2902_s16 = scalar_lea.hbm %s3448_s10, %s2856_s21  ;;  %s2379_s0 = scalar_lea.hbm %s3448_s10, 512 }
  0x74   : > { %s2374_s8 = scalar_lea.hbm %s2902_s16, 256  ;;  %p2380_p12 = scmp.lt.u32.totalorder %s2902_s16, %s3448_s10 }
  0x75   : > { %p2375_p2 = scmp.ne.s32.totalorder %s2902_s16, %s2374_s8  ;;  %p2381_p0 = scmp.lt.u32.totalorder %s2379_s0, %s2374_s8 }
  0x76   : > { %p2383_p4 = scmp.lt.u32.totalorder %s2374_s8, %s2902_s16 }
  0x77   : > { %p2377_p8 = pnand %p2375_p2, %p2871_p10  ;;  %p2382_p3 = por %p2381_p0, %p2380_p12 }
  0x79   : > { %p2378_p9 = pneg %p2377_p8  ;;  %p2384_p5 = por %p2383_p4, %p2382_p3 }
  0x7b   : > { %p2385_p1 = pnand %p2384_p5, %p2378_p9 }
  0x7d   : > { %2388 = shalt.err (!%p2385_p1)
}
  0x7e   : > { %s2389_s17 = scalar_lea.vmem %s2905_s7, 256  ;;  %s2598_s28 = smov [#allocation9]  }
  0x7f   : > { %p2390_p13 = scmp.ne.s32.totalorder %s2905_s7, %s2389_s17  ;;  %s2394_s30 = sshll.u32 %s2598_s28, 4  ;;  %s2395_s30 = int_to_ptr.vmem [resolvable:$false] %s2394_s30 }
  0x80   : > { %s2396_s29 = scalar_lea.vmem %s2395_s30, 512  ;;  %p2397_p2 = scmp.lt.s32.totalorder %s2905_s7, %s2395_s30 }
  0x81   : > { %p2392_p6 = pnand %p2390_p13, %p2871_p10  ;;  %p2398_p8 = scmp.lt.s32.totalorder %s2396_s29, %s2389_s17 }
  0x83   : > { %p2393_p7 = pneg %p2392_p6  ;;  %p2399_p12 = por %p2398_p8, %p2397_p2 }
  0x85   : > { %p2400_p0 = pnand %p2399_p12, %p2393_p7 }
  0x87   : > { %2403 = shalt.err (!%p2400_p0)
}
  0x88   : > { %2175 = dma.hbm_to_vmem [thread:$0]  (!%p2818_p11), %s2902_s16, 256, %s2905_s7, %s2823_s12, %s3389_s18, %s3389_s18, %s3390_s20  }
  0x89   : > { %s2933_s8 = sadd.s32 4294967295, %s2592_s4   ;;  %s1981_s0 = sadd.s32 4294967294, %s2592_s4  }
  0x8a   : > { %p69_p9 = scmp.ne.s32.totalorder %s2568_s2, %s2564_s24  ;;  %p3393_p3 = scmp.eq.s32.totalorder %s2933_s8, 0 }
  0x8b   : > { %p267_p4 = scmp.ne.s32.totalorder %s2556_s22, %s2552_s1  ;;  %p577_p5 = scmp.eq.s32.totalorder %s2933_s8, 3 }
  0x8c   : > { %p583_p1 = scmp.eq.s32.totalorder %s1981_s0, 3  ;;  %p2944_p13 = por %p3393_p3, %p69_p9 }
  0x8d   : > { %p2950_p6 = por %p267_p4, %p3393_p3  ;;  %p3451_p7 = scmp.ne.s32.totalorder %s2572_s25, %s2568_s2 }
  0x8e   : > { %s3449_s11 = scalar_select %p2944_p13, 1, 0 }
  0x8f   : > { %s3450_s16 = scalar_select %p2950_p6, 1, 0 }
  0x90   : > { %p2957_p2 = por %p577_p5, %p3451_p7  ;;  %p2961_p8 = por %p583_p1, %p69_p9 }
  0x91   : > { %p1982_p12 = scmp.ge.s32.totalorder %s2592_s4, 1  ;;  %p590_p0 = scmp.lt.s32.totalorder %s2592_s4, 5 }
  0x92   : > { %s3452_s7 = scalar_select %p2957_p2, 1, 0 }
  0x93   : > { %s3454_s1 = scalar_select %p2961_p8, 1, 0 }
  0x94   : > { %3453 = sst [smem:[#allocation28_spill]] %s3452_s7  ;;  %p2967_p11 = pnand %p1982_p12, %p590_p0 }
  0x95   : > { %3455 = sst [smem:[#allocation29_spill]] %s3454_s1  ;;  %s2599_s28 = smov [#allocation6]  }
  0x96   : > { %s3456_s17 = scalar_select %p2967_p11, 1, 0 }
  0x97   : > { %s603_s30 = sshll.u32 %s2599_s28, 4  ;;  %p2162_p4 = pneg %p2967_p11  ;;  %s2979_s30 = int_to_ptr.vmem [resolvable:$true] %s603_s30 }
  0x98   : > { %s3457_s14 = sld [smem:[#allocation43_spill]]  ;;  %s739_s20 = scalar_lea.vmem [#allocation10], %s2853_s13 }
  0x99   : > { %s746_s10 = sshll.u32 %s739_s20, 4  ;;  %p2984_p9 = pnand %p2162_p4, %p3393_p3  ;;  %s2988_s10 = int_to_ptr.vmem [resolvable:$true] %s746_s10 }
  0x9e   : > { %s2977_s18 = scalar_lea.hbm %s3457_s14, %s2856_s21  ;;  %s2409_s0 = scalar_lea.hbm %s3457_s14, 512 }
  0x9f   : > { %s2404_s28 = scalar_lea.hbm %s2977_s18, 256  ;;  %p2410_p12 = scmp.lt.u32.totalorder %s2977_s18, %s3457_s14 }
  0xa0   : > { %p2405_p5 = scmp.ne.s32.totalorder %s2977_s18, %s2404_s28  ;;  %p2411_p0 = scmp.lt.u32.totalorder %s2409_s0, %s2404_s28 }
  0xa1   : > { %p2413_p3 = scmp.lt.u32.totalorder %s2404_s28, %s2977_s18 }
  0xa2   : > { %p2407_p1 = pnand %p2405_p5, %p2871_p10  ;;  %p2412_p4 = por %p2411_p0, %p2410_p12 }
  0xa4   : > { %p2408_p7 = pneg %p2407_p1  ;;  %p2414_p8 = por %p2413_p3, %p2412_p4 }
  0xa6   : > { %p2415_p2 = pnand %p2414_p8, %p2408_p7 }
  0xa8   : > { %2418 = shalt.err (!%p2415_p2)
}
  0xa9   : > { %s2419_s13 = scalar_lea.vmem %s2988_s10, 256  ;;  %s2600_s20 = smov [#allocation10]  }
  0xaa   : > { %p2420_p5 = scmp.ne.s32.totalorder %s2988_s10, %s2419_s13  ;;  %s2424_s21 = sshll.u32 %s2600_s20, 4  ;;  %s2425_s21 = int_to_ptr.vmem [resolvable:$false] %s2424_s21 }
  0xab   : > { %s2426_s15 = scalar_lea.vmem %s2425_s21, 512  ;;  %p2427_p13 = scmp.lt.s32.totalorder %s2988_s10, %s2425_s21 }
  0xac   : > { %p2422_p1 = pnand %p2420_p5, %p2871_p10  ;;  %p2428_p11 = scmp.lt.s32.totalorder %s2426_s15, %s2419_s13 }
  0xae   : > { %p2423_p6 = pneg %p2422_p1  ;;  %p2429_p12 = por %p2428_p11, %p2427_p13 }
  0xb0   : > { %p2430_p0 = pnand %p2429_p12, %p2423_p6 }
  0xb2   : > { %2433 = shalt.err (!%p2430_p0)
}
  0xb3   : > { %p3459_p3 = scmp.ne.s32.totalorder %s3445_s9, 0  ;;  %s3460_s25 = smov 4  }
  0xb4   : > { %s3461_s28 = smov 64   ;;  %s3462_s0 = sld [smem:[#allocation31_spill]] }
  0xb5   : > { %2178 = dma.hbm_to_vmem [thread:$0]  (!%p3459_p3), %s2977_s18, 256, %s2988_s10, %s2823_s12, %s3461_s28, %s3461_s28, %s3460_s25  }
  0xb6   : > { %p2436_p10 = pneg %p2984_p9 }
  0xba   : > { %s2434_s20 = scalar_lea.hbm %s3462_s0, 128 }
  0xbb   : > { %p2435_p11 = scmp.ne.s32.totalorder %s3462_s0, %s2434_s20  ;;  %p2441_p2 = scmp.lt.u32.totalorder %s2434_s20, %s3462_s0 }
  0xbd   : > { %p2437_p13 = pnand %p2436_p10, %p2435_p11 }
  0xbf   : > { %p2438_p6 = pneg %p2437_p13 }
  0xc1   : > { %p2443_p8 = pnand %p2441_p2, %p2438_p6 }
  0xc3   : > { %2446 = shalt.err (!%p2443_p8)
}
  0xc4   : > { %s2447_s10 = scalar_lea.vmem %s2979_s30, 128  ;;  %p2455_p1 = scmp.lt.s32.totalorder %s2979_s30, %s2979_s30 }
  0xc5   : > { %p2448_p7 = scmp.ne.s32.totalorder %s2979_s30, %s2447_s10  ;;  %p2456_p12 = scmp.lt.s32.totalorder %s2447_s10, %s2447_s10 }
  0xc7   : > { %p2450_p4 = pnand %p2448_p7, %p2436_p10  ;;  %p2457_p0 = por %p2456_p12, %p2455_p1 }
  0xc9   : > { %p2451_p5 = pneg %p2450_p4 }
  0xcb   : > { %p2458_p3 = pnand %p2457_p0, %p2451_p5 }
  0xcd   : > { %2461 = shalt.err (!%p2458_p3)
}
  0xce   : > { %2165 = dma.hbm_to_vmem [thread:$0]  (!%p2984_p9), %s3462_s0, 128, %s2979_s30, [#allocation7]  }
  0xcf   : > { %p3463_p11 = scmp.ne.s32.totalorder %s3456_s17, 0 }
  0xd0   : > { %s792_s18 = sand.u32 (!%p3463_p11), 1, %s2933_s8   ;;  %s3398_s15 = sand.u32 (!%p3463_p11), 1, %s2568_s2  }
  0xd1   : > { %790 = sbr.rel (%p3463_p11) target bundleno = 2546 (0x9f2), region = 100  ;;  %s3042_s25 = sshll.u32 (!%p3463_p11), %s3398_s15, 3 }
  0xd2   : > { %s793_s28 = scalar_lea.sflag (!%p3463_p11), [#allocation4], %s792_s18  ;;  %p3464_p10 = scmp.ne.s32.totalorder (!%p3463_p11), %s3449_s11, 0 }
  0xd8   : > { %2535 = dma.done.wait (%p3464_p10), %s793_s28, 128  }
  0xd9   : > { %2537 = vsyncadd (%p3464_p10), %s793_s28, 4294967168  ;;  %p3465_p9 = scmp.eq.s32.totalorder %s2933_s8, 0 }
  0xdb   : > { %2539 = dma.done.wait (%p3465_p9), [#allocation7], 128   ;;  %p3466_p13 = pmov %p3465_p9 }
  0xdc   : > { %s807_s17 = sand.u32 1, %s2556_s22   ;;  %p3467_p6 = scmp.ne.s32.totalorder %s3450_s16, 0 }
  0xdd   : > { %2541 = vsyncadd (%p3466_p13), [#allocation7], 4294967168  ;;  %s3054_s30 = sshll.u32 %s807_s17, 4 }
  0xde   : > { %2543 = dma.done.wait (%p3467_p6), %s793_s28, 768  }
  0xdf   : > { %2545 = vsyncadd (%p3467_p6), %s793_s28, 4294966528  ;;  %p947_p2 = scmp.lt.s32.totalorder %s2580_s26, 1  ;;  %p950_p8 = scmp.lt.s32.totalorder %s2576_s3, 1 }
  0xe0   : > { %s3469_s28 = sld [smem:[#allocation34_spill]]  ;;  %s3470_s6 = sld [smem:[#allocation35_spill]] }
  0xe1   : > { %s3064_s8 = scalar_select %p947_p2, %s2580_s26, 1 }
  0xe2   : > { %s3067_s11 = scalar_select %p950_p8, %s2576_s3, 1 }
  0xe3   : > { %s3473_s1 = sld [smem:[#allocation40_spill]]  ;;  %s3476_s27 = sld [smem:[#allocation44_spill]] }
  0xe4   : > { %s2053_s9 = sshll.u32 %s3067_s11, 4  ;;  %s2055_s21 = sshll.u32 %s3067_s11, 5 }
  0xe5   : > { %s3477_s22 = sld [smem:[#allocation46_spill]]  ;;  %s3480_s29 = sld [smem:[#allocation48_spill]] }
  0xe6   : > { %s3081_s17 = scalar_lea.vmem %s3469_s28, %s2053_s9  ;;  %s962_s15 = scalar_lea.vmem %s3470_s6, %s2053_s9 }
  0xe7   : > { %s3479_s28 = sld [smem:[#allocation47_spill]]  ;;  %s818_s6 = scalar_lea.vmem [#allocation9], %s3054_s30 }
  0xe8   : > { %s827_s20 = scalar_lea.vmem [#allocation10], %s3054_s30  ;;  %p2009_p7 = scmp.ne.s32.totalorder %s2576_s3, 0 }
  0xe9   : > { %s971_s24 = scalar_lea.vmem %s3473_s1, %s3067_s11  ;;  %s980_s19 = scalar_lea.vmem %s3476_s27, %s3067_s11  ;;  %v1001_v1 = vld [vmem:[#allocation6] sm:$0xff] (!%p2009_p7)  ;;  %vm1003_vm0 = vcmask (!%p2009_p7), 261120  }
  0xea   : > { %s3478_s1 = sld [smem:[#allocation45_spill]]  ;;  %s946_s27 = scalar_lea.vmem [#allocation11], %s3042_s25 }
  0xeb   : > { %s988_s0 = scalar_lea.vmem %s3477_s22, %s3067_s11  ;;  %s994_s9 = scalar_lea.vmem %s3480_s29, %s3067_s11 }
  0xec   : > { %999 = sbr.rel (%p2009_p7) target bundleno = 243 (0xf3), region = 124  ;;  %s3481_s16 = scalar_lea.vmem (!%p2009_p7), [#allocation3], %s3042_s25 }
  0xed   : > { %s991_s4 = scalar_lea.vmem %s3479_s28, %s3067_s11  ;;  %v1000_v0 = vld [vmem:[%s3481_s16] sm:$0xff] (!%p2009_p7) }
  0xee   : > { %v1002_v2 = vadd.f32 (!%p2009_p7), %v1001_v1, %v1000_v0 }
  0xf0   : > { %s3118_s10 = scalar_lea.vmem %s3478_s1, %s2055_s21  ;;  %1004 = vst.msk [vmem:[#allocation2] sm:$0xff] (!%p2009_p7), %vm1003_vm0, %v1002_v2 }
  0xf3 PF: > { %v2280_v3 = vld [vmem:[%s962_s15] sm:$0xff]   ;;  %v2601_v4 = vmov 0.0   ;;  %v2282_v6 = vld [vmem:[%s962_s15 + $0x8] sm:$0xff]   ;;  %vm2602_vm1 = vmmov 0   ;;  %vm1030_vm2 = vcmask 261120   ;;  %s3482_s13 = sld [smem:[#allocation36_spill]]  ;;  %s3484_s14 = scalar_lea.vmem %s3363_s5, %s3067_s11 }
  0xf4   : > { %2090 = vmatprep.subr.bf16.mxu1 %v2601_v4  ;;  %2082 = vmatprep.subr.bf16.mxu0 %v2601_v4  ;;  %v2281_v5 = vld [vmem:[%s3081_s17] sm:$0xff]   ;;  %v2283_v7 = vld [vmem:[%s3081_s17 + $0x8] sm:$0xff]   ;;  %s3485_s18 = sld [smem:[#allocation33_spill]]  ;;  %s3486_s17 = scalar_lea.vmem [#allocation8], %s3054_s30  ;;  %vm1277_vm3 = vcmask 64512   ;;  %vm1330_vm4 = vcmask 1043456  }
  0xf5   : > { %2091 = vmatpush3.bf16.msra.mxu1 %v2280_v3  ;;  %2094 = vmatprep.mubr.msk.bf16.mxu1 %vm2602_vm1, %v2601_v4  ;;  %v2010_v11 = vld [vmem:[%s3484_s14] ss:$0 sm:$0xff]  ;;  %s3488_s22 = sld [smem:[#allocation32_spill]]  ;;  %s3490_s12 = sld [smem:[#allocation38_spill]]  ;;  %vm1600_vm5 = vcmask 523264  }
  0xf6   : > { %2083 = vmatpush3.bf16.msra.mxu0 %v2281_v5  ;;  %2092 = vmatprep.subr.bf16.mxu1 %v2601_v4  ;;  %v2284_v34 = vld [vmem:[%s3486_s17] sm:$0xff]   ;;  %p2045_p4 = scmp.ne.s32.totalorder %s2576_s3, 1 }
  0xf7   : > { %2084 = vmatprep.subr.bf16.mxu0 %v2601_v4  ;;  %v3142_v8 = vld [vmem:[#allocation2] sm:$0xff]  ;;  %2086 = vmatprep.mubr.msk.bf16.mxu0 %vm2602_vm1, %v2601_v4 }
  0xf8   : > { %v1006_v9 = vpack.c.bf16 %v3142_v8, %v3142_v8 }
  0xf9   : > { %2093 = vmatpush3.bf16.msra.mxu1 %v2282_v6  ;;  %s3483_s21 = scalar_lea.vmem %s3482_s13, %s3067_s11  ;;  %s3487_s13 = smov %s3486_s17 }
  0xfa   : > { %2085 = vmatpush3.bf16.msra.mxu0 %v2283_v7  ;;  %v2014_v10 = vld [vmem:[%s3483_s21] ss:$0 sm:$0xff]  ;;  %v3171_v17 = vld [vmem:[%s3485_s18 + $0x8] sm:$0xff]  ;;  %v3176_v20 = vld [vmem:[%s3485_s18 + $0x10] sm:$0xff]  ;;  %s3495_s17 = sld [smem:[#allocation42_spill]] }
  0xfb   : > { %2098 = vmatprep.subr.bf16.mxu0 %v2601_v4  ;;  %v3166_v16 = vld [vmem:[%s3485_s18] sm:$0xff]  ;;  %v3181_v21 = vld [vmem:[%s3485_s18 + $0x18] sm:$0xff]  ;;  %v2285_v35 = vld [vmem:[%s3487_s13 + $0x8] sm:$0xff]   ;;  %s3489_s14 = scalar_lea.vmem %s3488_s22, %s3064_s8  ;;  %s3491_s28 = scalar_lea.vmem %s3490_s12, %s3067_s11 }
  0xfc   : > { %2095 = vmatmul.mubr.msk.bf16.vlgmr.msra.gmra.mrb[0].mxu1 %vm1030_vm2, %v1006_v9  ;;  %v2022_v36 = vld [vmem:[%s3489_s14] ss:$0 sm:$0xff] }
  0xfd   : > { %2087 = vmatmul.mubr.msk.bf16.vlgmr.msra.gmra.mrb[0].mxu0 %vm1030_vm2, %v1006_v9 }
  0xfe   : > { %2102 = vmatprep.mubr.msk.bf16.mxu0 %vm2602_vm1, %v2601_v4  ;;  %2099 = vmatpush3.bf16.msra.mxu0 %v2284_v34  ;;  %v2287_v34 = vld [vmem:[%s818_s6 + $0x8] sm:$0xff]  }
  0xff   : > { %2100 = vmatprep.subr.bf16.mxu0 %v2601_v4 }
 0x100   : > { %s3496_s13 = scalar_lea.vmem %s3495_s17, %s3067_s11 }
 0x102   : > { %2101 = vmatpush3.bf16.msra.mxu0 %v2285_v35 }
 0x105   : > { %2103 = vmatmul.mubr.msk.bf16.vlgmr.msra.gmra.mrb[4].mxu0 %vm1030_vm2, %v1006_v9 }
 0x1cf   : > { %v1131_v12 = vpop.f32.mrb[0].mxu1 }
 0x1d0   : > { %v1132_v13 = vadd.f32 %v2014_v10, %v1131_v12  ;;  %v2096_v14 = vpop.f32.mrb[1].mxu1  ;;  %v1068_v15 = vpop.f32.mrb[0].mxu0  ;;  %v2018_v10 = vld [vmem:[%s3491_s28] ss:$0 sm:$0xff] }
 0x1d1   : > { %v1134_v18 = vpop.f32.mrb[2].mxu1  ;;  %v1069_v19 = vadd.f32 %v2010_v11, %v1068_v15  ;;  %v2088_v22 = vpop.f32.mrb[1].mxu0 }
 0x1d2   : > { %v1200_v23 = vpack.c.bf16 %v1132_v13, %v1132_v13  ;;  %v2097_v24 = vpop.f32.mrb[3].mxu1  ;;  %v1071_v25 = vpop.f32.mrb[2].mxu0 }
 0x1d3   : > { %v1206_v26 = vmul.f32 %v3166_v16, %v1069_v19  ;;  %v1207_v27 = vmul.f32 %v3171_v17, %v1069_v19  ;;  %v2089_v28 = vpop.f32.mrb[3].mxu0  ;;  %v1208_v30 = vmul.f32 %v3176_v20, %v1069_v19  ;;  %v1209_v31 = vmul.f32 %v3181_v21, %v1069_v19 }
 0x1d4   : > { %v1226_v29 = vsel %vm1030_vm2, %v1200_v23, 0  ;;  %2146 = vmatprep.subr.msk.bf16.mxu1 %vm1030_vm2, %v1200_v23 }
 0x1d5   : > { %2107 = vmatpush3.bf16.xpose.msra.mxu1 %v1226_v29  ;;  %v1210_v32 = vpack.c.bf16 %v1207_v27, %v1206_v26  ;;  %v1211_v33 = vpack.c.bf16 %v1209_v31, %v1208_v30 }
 0x1d6   : > { %2118 = vmatprep.subr.bf16.mxu1 %v2601_v4 }
 0x1d7   : > { %2108 = vmatprep.mubr.msk.bf16.mxu1 %vm1030_vm2, %v1210_v32 }
 0x1d8   : > { %v1194_v6 = vpop.f32.mrb[4].mxu0 }
 0x1d9   : > { %v2104_v7 = vpop.f32.mrb[5].mxu0  ;;  %v1195_v12 = vadd.f32 %v2018_v10, %v1194_v6  ;;  %v2292_v6 = vld [vmem:[%s3118_s10 + $0x10] sm:$0xff]  }
 0x1da   : > { %v1197_v9 = vpop.f32.mrb[6].mxu0  ;;  %v2293_v7 = vld [vmem:[%s3118_s10 + $0x18] sm:$0xff]  }
 0x1db   : > { %v2105_v11 = vpop.f32.mrb[7].mxu0  ;;  %v1201_v13 = vpack.c.bf16 %v1195_v12, %v1195_v12  ;;  %v2033_v9 = vld [vmem:[%s980_s19] ss:$0 sm:$0xff] }
 0x1dc   : > { %2109 = vmatmul.mubr.msk.bf16.vlgmr.msra.gmra.mrb[4].mxu1 %vm1030_vm2, %v1211_v33  ;;  %v2286_v33 = vld [vmem:[%s818_s6] sm:$0xff]  }
 0x1dd   : > { %2122 = vmatprep.mubr.msk.bf16.mxu1 %vm2602_vm1, %v2601_v4  ;;  %v1332_v14 = vsel %vm1330_vm4, %v1201_v13, 0  ;;  %2147 = vmatprep.subr.msk.bf16.mxu0 %vm1330_vm4, %v1201_v13 }
 0x1de   : > { %2113 = vmatpush3.bf16.msra.mxu0 %v1332_v14  ;;  %2119 = vmatpush3.bf16.msra.mxu1 %v2286_v33 }
 0x1df   : > { %2126 = vmatprep.subr.bf16.mxu0 %v2601_v4  ;;  %2120 = vmatprep.subr.bf16.mxu1 %v2601_v4 }
 0x1e2   : > { %2121 = vmatpush3.bf16.msra.mxu1 %v2287_v34 }
 0x1e3   : > { %2134 = vmatprep.subr.bf16.mxu1 %v2601_v4 }
 0x2af   : > { %v2110_v37 = vpop.f32.mrb[4].mxu1 }
 0x2b0   : > { %v1271_v38 = vadd.f32 %v2110_v37, %v2022_v36  ;;  %v1262_v39 = vpop.f32.mrb[5].mxu1 }
 0x2b1   : > { %v1263_v40 = vadd.f32 %v2022_v36, %v1262_v39  ;;  %v2111_v41 = vpop.f32.mrb[6].mxu1 }
 0x2b2   : > { %v1274_v42 = vadd.f32 %v2111_v41, %v2022_v36  ;;  %v1265_v43 = vpop.f32.mrb[7].mxu1  ;;  %v1284_v44 = vsel %vm1277_vm3, %v1271_v38, -inf }
 0x2b3   : > { %v1266_v45 = vadd.f32 %v2022_v36, %v1265_v43  ;;  %1285 = vmax.xlane.f32.xlu1 %v1284_v44  ;;  %v1278_v46 = vsel %vm1277_vm3, %v1263_v40, -inf }
 0x2b4   : > { %1279 = vmax.xlane.f32.xlu0 %v1278_v46  ;;  %v1287_v47 = vsel %vm1277_vm3, %v1274_v42, -inf }
 0x2b5   : > { %v1281_v48 = vsel %vm1277_vm3, %v1266_v45, -inf }
 0x2b7   : > { %1288 = vmax.xlane.f32.xlu1 %v1287_v47 }
 0x2b8   : > { %1282 = vmax.xlane.f32.xlu0 %v1281_v48 }
 0x340   : > { %v1286_v49 = vpop.xlane.xlu1 %1285 }
 0x341   : > { %v1292_v50 = vsub.f32 %v1271_v38, %v1286_v49  ;;  %v1280_v51 = vpop.xlane.xlu0 %1279 }
 0x342   : > { %v1290_v52 = vsub.f32 %v1263_v40, %v1280_v51 }
 0x343   : > { %v1298_v53 = vmul.f32 1.442695, %v1292_v50 }
 0x344   : > { %v1294_v54 = vmul.f32 1.442695, %v1290_v52  ;;  %v1289_v55 = vpop.xlane.xlu1 %1288 }
 0x345   : > { %v1293_v56 = vsub.f32 %v1274_v42, %v1289_v55  ;;  %v1283_v57 = vpop.xlane.xlu0 %1282 }
 0x346   : > { %2294 = vpow2.f32 %v1294_v54  ;;  %v1291_v58 = vsub.f32 %v1266_v45, %v1283_v57  ;;  %v2289_v57 = vld [vmem:[%s827_s20 + $0x8] sm:$0xff]  }
 0x347   : > { %2296 = vpow2.f32 %v1298_v53  ;;  %v1300_v59 = vmul.f32 1.442695, %v1293_v56  ;;  %v2288_v56 = vld [vmem:[%s827_s20] sm:$0xff]   ;;  %s3493_s20 = sld [smem:[#allocation41_spill]] }
 0x348   : > { %v1296_v60 = vmul.f32 1.442695, %v1291_v58  ;;  %v2291_v58 = vld [vmem:[%s3118_s10 + $0x8] sm:$0xff]  }
 0x34a   : > { %2298 = vpow2.f32 %v1296_v60 }
 0x34b   : > { %2300 = vpow2.f32 %v1300_v59 }
 0x34d   : > { %s3494_s29 = scalar_lea.vmem %s3493_s20, %s3067_s11 }
 0x350   : > { %v2295_v61 = vpop.eup %2294 }
 0x351   : > { %v1302_v62 = vsel %vm1277_vm3, %v2295_v61, 0.0  ;;  %v2297_v63 = vpop.eup %2296 }
 0x352   : > { %1303 = vadd.xlane.f32.xlu0 %v1302_v62  ;;  %v1308_v1 = vsel %vm1277_vm3, %v2297_v63, 0.0 }
 0x354   : > { %v2299_v0 = vpop.eup %2298 }
 0x355   : > { %v1305_v2 = vsel %vm1277_vm3, %v2299_v0, 0.0  ;;  %v2301_v3 = vpop.eup %2300 }
 0x356   : > { %1309 = vadd.xlane.f32.xlu0 %v1308_v1  ;;  %1306 = vadd.xlane.f32.xlu1 %v1305_v2  ;;  %v1311_v5 = vsel %vm1277_vm3, %v2301_v3, 0.0  ;;  %v2032_v1 = vld [vmem:[%s3496_s13] ss:$0 sm:$0xff] }
 0x35a   : > { %1312 = vadd.xlane.f32.xlu1 %v1311_v5 }
 0x3df   : > { %v1304_v15 = vpop.xlane.xlu0 %1303 }
 0x3e0   : > { %2302 = vrcp.f32 %v1304_v15 }
 0x3e3   : > { %v1307_v18 = vpop.xlane.xlu1 %1306  ;;  %v1310_v19 = vpop.xlane.xlu0 %1309 }
 0x3e4   : > { %2304 = vrcp.f32 %v1307_v18 }
 0x3e5   : > { %2306 = vrcp.f32 %v1310_v19 }
 0x3e7   : > { %v1313_v22 = vpop.xlane.xlu1 %1312 }
 0x3e8   : > { %2308 = vrcp.f32 %v1313_v22 }
 0x3ea   : > { %v2303_v23 = vpop.eup %2302 }
 0x3eb   : > { %v1318_v25 = vmul.f32 %v2303_v23, %v2295_v61 }
 0x3ee   : > { %v2305_v24 = vpop.eup %2304 }
 0x3ef   : > { %v1319_v26 = vmul.f32 %v2305_v24, %v2299_v0  ;;  %v2307_v27 = vpop.eup %2306 }
 0x3f0   : > { %v1320_v30 = vmul.f32 %v2307_v27, %v2297_v63  ;;  %v2031_v63 = vld [vmem:[%s3494_s29] ss:$0 sm:$0xff] }
 0x3f1   : > { %v1322_v28 = vpack.c.bf16 %v1319_v26, %v1318_v25 }
 0x3f2   : > { %v2309_v29 = vpop.eup %2308 }
 0x3f3   : > { %v1321_v31 = vmul.f32 %v2309_v29, %v2301_v3  ;;  %2114 = vmatprep.mubr.msk.bf16.mxu0 %vm1277_vm3, %v1322_v28 }
 0x3f5   : > { %v1323_v32 = vpack.c.bf16 %v1321_v31, %v1320_v30 }
 0x3f7   : > { %2115 = vmatmul.mubr.msk.bf16.vlgmr.msra.gmra.mrb[8].mxu0 %vm1277_vm3, %v1323_v32 }
 0x3f8   : > { %2130 = vmatprep.mubr.msk.bf16.mxu0 %vm2602_vm1, %v2601_v4  ;;  %2127 = vmatpush3.bf16.msra.mxu0 %v2288_v56 }
 0x3f9   : > { %2128 = vmatprep.subr.bf16.mxu0 %v2601_v4 }
 0x3fc   : > { %2129 = vmatpush3.bf16.msra.mxu0 %v2289_v57 }
 0x4ca   : > { %v2116_v35 = vpop.f32.mrb[8].mxu0 }
 0x4cb   : > { %v1368_v36 = vpop.f32.mrb[9].mxu0  ;;  %v1389_v41 = vmul.f32 %v2116_v35, %v3176_v20 }
 0x4cc   : > { %v2117_v37 = vpop.f32.mrb[10].mxu0  ;;  %v1387_v39 = vmul.f32 %v1368_v36, %v3166_v16  ;;  %v2027_v16 = vld [vmem:[%s971_s24] ss:$0 sm:$0xff] }
 0x4cd   : > { %v1371_v38 = vpop.f32.mrb[11].mxu0  ;;  %v1390_v43 = vmul.f32 %v2117_v37, %v3181_v21  ;;  %v2043_v37 = vld [vmem:[%s991_s4] ss:$0 sm:$0xff] }
 0x4ce   : > { %v1388_v40 = vmul.f32 %v1371_v38, %v3171_v17 }
 0x4d0   : > { %v1391_v42 = vadd.f32 %v1388_v40, %v1387_v39  ;;  %v2044_v39 = vld [vmem:[%s994_s9] ss:$0 sm:$0xff] }
 0x4d2   : > { %v1392_v44 = vadd.f32 %v1391_v42, %v1389_v41 }
 0x4d4   : > { %v1393_v45 = vadd.f32 %v1392_v44, %v1390_v43 }
 0x4d6   : > { %v1394_v46 = vpack.c.bf16 %v1393_v45, %v1393_v45 }
 0x4d8   : > { %2123 = vmatmul.mubr.msk.bf16.vlgmr.msra.gmra.mrb[8].mxu1 %vm1030_vm2, %v1394_v46 }
 0x4d9   : > { %2142 = vmatprep.mubr.msk.bf16.mxu1 %vm2602_vm1, %v2601_v4 }
 0x5ab   : > { %v1455_v17 = vpop.f32.mrb[8].mxu1 }
 0x5ac   : > { %v1456_v20 = vadd.f32 %v2027_v16, %v1455_v17  ;;  %v2124_v47 = vpop.f32.mrb[9].mxu1 }
 0x5ad   : > { %v1458_v48 = vpop.f32.mrb[10].mxu1 }
 0x5ae   : > { %v2125_v21 = vpop.f32.mrb[11].mxu1  ;;  %v1461_v49 = vadd.f32 %v1456_v20, %v3142_v8  ;;  %v2290_v8 = vld [vmem:[%s3118_s10] sm:$0xff]  }
 0x5af   : > { %2135 = vmatpush3.bf16.msra.mxu1 %v2290_v8 }
 0x5b0   : > { %v1462_v50 = vsel %vm1030_vm2, %v1461_v49, 0.0  ;;  %2136 = vmatprep.subr.bf16.mxu1 %v2601_v4 }
 0x5b1   : > { %1463 = vadd.xlane.f32.xlu0 %v1462_v50 }
 0x5b3   : > { %2137 = vmatpush3.bf16.msra.mxu1 %v2291_v58 }
 0x5b4   : > { %2138 = vmatprep.subr.bf16.mxu1 %v2601_v4 }
 0x5b7   : > { %2139 = vmatpush3.bf16.msra.mxu1 %v2292_v6 }
 0x5b8   : > { %2140 = vmatprep.subr.bf16.mxu1 %v2601_v4  ;;  %v2037_v4 = vld [vmem:[%s988_s0] ss:$0 sm:$0xff] }
 0x5bb   : > { %2141 = vmatpush3.bf16.msra.mxu1 %v2293_v7 }
 0x63e   : > { %v1464_v51 = vpop.xlane.xlu0 %1463 }
 0x63f   : > { %v1466_v52 = vmul.f32 0.03125, %v1464_v51 }
 0x641   : > { %v1467_v53 = vsub.f32 %v1461_v49, %v1466_v52 }
 0x643   : > { %v1468_v54 = vmul.f32 %v1467_v53, %v1467_v53 }
 0x645   : > { %v1469_v55 = vsel %vm1030_vm2, %v1468_v54, 0.0 }
 0x646   : > { %1470 = vadd.xlane.f32.xlu1 %v1469_v55 }
 0x6d3   : > { %v1471_v59 = vpop.xlane.xlu1 %1470 }
 0x6d4   : > { %v1472_v60 = vmul.f32 0.03125, %v1471_v59 }
 0x6d6   : > { %v1473_v61 = vadd.f32 1e-05, %v1472_v60 }
 0x6d8   : > { %2310 = vrsqrt.f32 %v1473_v61 }
 0x6e2   : > { %v2311_v62 = vpop.eup %2310 }
 0x6e3   : > { %v1475_v0 = vmul.f32 %v2311_v62, %v1467_v53 }
 0x6e5   : > { %v1483_v2 = vmul.f32 %v2031_v63, %v1475_v0 }
 0x6e7   : > { %v1491_v3 = vadd.f32 %v2032_v1, %v1483_v2 }
 0x6e9   : > { %v1492_v5 = vpack.c.bf16 %v1491_v3, %v1491_v3 }
 0x6eb   : > { %2131 = vmatmul.mubr.msk.bf16.vlgmr.msra.gmra.mrb[12].mxu0 %vm1030_vm2, %v1492_v5 }
 0x7be   : > { %v1553_v10 = vpop.f32.mrb[12].mxu0 }
 0x7bf   : > { %v1554_v11 = vadd.f32 %v2033_v9, %v1553_v10  ;;  %v2132_v12 = vpop.f32.mrb[13].mxu0 }
 0x7c0   : > { %v1556_v13 = vpop.f32.mrb[14].mxu0 }
 0x7c1   : > { %v1559_v14 = vmax.f32 %v1554_v11, 0.0  ;;  %v2133_v15 = vpop.f32.mrb[15].mxu0 }
 0x7c3   : > { %v1560_v18 = vpack.c.bf16 %v1559_v14, %v1559_v14 }
 0x7c5   : > { %2143 = vmatmul.mubr.msk.bf16.vlgmr.msra.gmra.mrb[12].mxu1 %vm1600_vm5, %v1560_v18 }
 0x898   : > { %v1638_v19 = vpop.f32.mrb[12].mxu1 }
 0x899   : > { %v1639_v22 = vadd.f32 %v2037_v4, %v1638_v19  ;;  %v2144_v23 = vpop.f32.mrb[13].mxu1 }
 0x89a   : > { %v1641_v24 = vpop.f32.mrb[14].mxu1 }
 0x89b   : > { %v2145_v25 = vpop.f32.mrb[15].mxu1  ;;  %v1644_v26 = vadd.f32 %v1639_v22, %v1491_v3 }
 0x89d   : > { %v1645_v27 = vsel %vm1030_vm2, %v1644_v26, 0.0 }
 0x89e   : > { %1646 = vadd.xlane.f32.xlu0 %v1645_v27 }
 0x92b   : > { %v1647_v28 = vpop.xlane.xlu0 %1646 }
 0x92c   : > { %v1648_v29 = vmul.f32 0.03125, %v1647_v28 }
 0x92e   : > { %v1649_v30 = vsub.f32 %v1644_v26, %v1648_v29 }
 0x930   : > { %v1650_v31 = vmul.f32 %v1649_v30, %v1649_v30 }
 0x932   : > { %v1651_v32 = vsel %vm1030_vm2, %v1650_v31, 0.0 }
 0x933   : > { %1652 = vadd.xlane.f32.xlu1 %v1651_v32 }
 0x9c0   : > { %v1653_v33 = vpop.xlane.xlu1 %1652 }
 0x9c1   : > { %v1654_v34 = vmul.f32 0.03125, %v1653_v33 }
 0x9c3   : > { %v1655_v35 = vadd.f32 1e-05, %v1654_v34 }
 0x9c5   : > { %2312 = vrsqrt.f32 %v1655_v35 }
 0x9cf   : > { %v2313_v36 = vpop.eup %2312 }
 0x9d0   : > { %v1657_v38 = vmul.f32 %v2313_v36, %v1649_v30  ;;  %1678 = sbr.rel (%p2045_p4) target bundleno = 2519 (0x9d7), region = 128 }
 0x9d2   : > { %v1665_v40 = vmul.f32 %v2043_v37, %v1657_v38 }
 0x9d4   : > { %v1673_v41 = vadd.f32 %v2044_v39, %v1665_v40 }
 0x9d6   : > { %1674 = vst.msk [vmem:[#allocation2] sm:$0xff] %vm1030_vm2, %v1673_v41  ;;  %1679 = vst.msk [vmem:[%s946_s27] sm:$0xff] (!%p2045_p4), %vm1030_vm2, %v1673_v41 }
 0x9d7 PF: > { %s3501_s4 = sld [smem:[#allocation19_spill]]  ;;  %s3502_s2 = sld [smem:[#allocation28_spill]] }
 0x9d8   : > { %s2047_s7 = sshll.u32 %s2580_s26, 7  ;;  %s3503_s9 = sld [smem:[#allocation49_spill]] }
 0x9d9   : > { %s1694_s20 = sshll.u32 %s946_s27, 4  ;;  %s2603_s15 = smov [#allocation11]   ;;  %s1695_s20 = int_to_ptr.vmem [resolvable:$true] %s1694_s20 }
 0x9da   : > { %s2462_s16 = scalar_lea.vmem %s1695_s20, 128  ;;  %s2466_s17 = sshll.u32 %s2603_s15, 4  ;;  %s2467_s17 = int_to_ptr.vmem [resolvable:$false] %s2466_s17 }
 0x9db   : > { %p2463_p5 = scmp.ne.s32.totalorder %s1695_s20, %s2462_s16  ;;  %s2468_s13 = scalar_lea.vmem %s2467_s17, 256 }
 0x9dc   : > { %p2469_p3 = scmp.lt.s32.totalorder %s1695_s20, %s2467_s17  ;;  %p2470_p11 = scmp.lt.s32.totalorder %s2468_s13, %s2462_s16 }
 0x9dd   : > { %s3504_s3 = sand.u32 1, %s3501_s4   ;;  %p3505_p1 = scmp.ne.s32.totalorder %s3502_s2, 0 }
 0x9de   : > { %s3298_s30 = scalar_lea.hbm %s3503_s9, %s2047_s7  ;;  %s1681_s29 = scalar_lea.sflag [#allocation5], %s3504_s3 }
 0x9df   : > { %p2464_p12 = pnand %p2463_p5, %p3505_p1  ;;  %p2471_p10 = por %p2470_p11, %p2469_p3 }
 0x9e1   : > { %p2465_p0 = pneg %p2464_p12 }
 0x9e3   : > { %p2472_p9 = pnand %p2471_p10, %p2465_p0 }
 0x9e5   : > { %2475 = shalt.err (!%p2472_p9)
}
 0x9e6   : > { %s2476_s26 = scalar_lea.hbm %s3298_s30, 128  ;;  %s2480_s21 = scalar_lea.hbm %s3503_s9, 256 }
 0x9e7   : > { %p2477_p13 = scmp.ne.s32.totalorder %s3298_s30, %s2476_s26  ;;  %p2481_p8 = scmp.lt.u32.totalorder %s3298_s30, %s3503_s9 }
 0x9e8   : > { %p2482_p7 = scmp.lt.u32.totalorder %s2480_s21, %s2476_s26  ;;  %p2484_p5 = scmp.lt.u32.totalorder %s2476_s26, %s3298_s30 }
 0x9e9   : > { %p2478_p6 = pnand %p2477_p13, %p3505_p1 }
 0x9ea   : > { %p2483_p4 = por %p2482_p7, %p2481_p8 }
 0x9eb   : > { %p2479_p2 = pneg %p2478_p6 }
 0x9ec   : > { %p2485_p12 = por %p2484_p5, %p2483_p4 }
 0x9ee   : > { %p2486_p0 = pnand %p2485_p12, %p2479_p2 }
 0x9f0   : > { %2489 = shalt.err (!%p2486_p0)
}
 0x9f1   : > { %2160 = dma.vmem_to_hbm [thread:$0]  (%p3505_p1), %s1695_s20, 128, %s3298_s30, %s1681_s29  }
 0x9f2 PF: > { %s3506_s14 = sld [smem:[#allocation23_spill]]  ;;  %s3507_s8 = sld [smem:[#allocation18_spill]] }
 0x9f3   : > { %s3508_s1 = sld [smem:[#allocation29_spill]] }
 0x9f8   : > { %p2186_p3 = scmp.ge.s32.totalorder %s3506_s14, 2  ;;  %s1706_s19 = sand.u32 1, %s3507_s8  }
 0x9f9   : > { %p3509_p11 = scmp.ne.s32.totalorder %s3508_s1, 0  ;;  %s1707_s0 = scalar_lea.sflag [#allocation5], %s1706_s19 }
 0x9fb   : > { %p2180_p10 = pnand %p2186_p3, %p3509_p11 }
 0x9fd   : > { %2547 = dma.done.wait (!%p2180_p10), %s1707_s0, 128  }
 0x9fe   : > { %2549 = vsyncadd (!%p2180_p10), %s1707_s0, 4294967168  ;;  %s37_s4 = sadd.s32 1, %s3506_s14   ;;  %s3510_s1 = sld [smem:[#allocation16_spill]] }
 0x9ff   : > { %p34_p9 = scmp.ge.s32.totalorder %s37_s4, 6   ;;  %s3511_s22 = sld [smem:[#allocation17_spill]] }
 0xa00   : > { %s3512_s23 = sld [smem:[#allocation26_spill]]  ;;  %s3513_s24 = sld [smem:[#allocation19_spill]] }
 0xa01   : > { %s3514_s2 = sld [smem:[#allocation20_spill]]  ;;  %s3515_s25 = sld [smem:[#allocation27_spill]] }
 0xa02   : > { %s3516_s3 = sld [smem:[#allocation21_spill]]  ;;  %s3517_s26 = sld [smem:[#allocation22_spill]] }
 0xa03   : > { %s3518_s27 = sld [smem:[#allocation24_spill]]  ;;  %s3519_s28 = sld [smem:[#allocation25_spill]] }
 0xa04   :  { %36 = sbr.rel (!%p34_p9) target bundleno = 31 (0x1f), region = 232 }
 0xa0b   :  { %1712 = vsyncpa [#allocation4], 1 }
 0xa0c   :  { %1714 = vsyncpa [#allocation4 + $0x1], 1 }
 0xa0d   :  { %1715 = vsyncpa [#allocation7], 1 }
 0xa0e   :  { %1716 = vsyncpa [#allocation5], 1 }
 0xa0f   :  { %1718 = vsyncpa [#allocation5 + $0x1], 1 }

</bundles_post_ra>
